<compile_context>
chip_gen: v7x
topology: tpu7x:2x2x1
jax: 0.10.0
libtpu: 0.0.40
codegen_flags: <defaults>
</compile_context>

<pallas_src>
import math

import jax
import jax.numpy as jnp
from jax.experimental import pallas as pl
from jax.experimental.pallas import tpu as pltpu

K = 16                    # feature dim of the Linear layer
PACK = 128                # tokens packed per lane-dense row
PACKED_W = PACK * K       # 2048 f32 lanes per packed row (8 KiB)
# Packed rows per grid step -> 4 MiB input block.  VMEM budget including the
# in-kernel temporaries (f32 product, bf16 operands, iota/selector temps):
#   2 x 4 MiB input bufs + ~8 MiB temps + ~0.5 MiB output bufs  ~= 19 MiB,
# comfortably under the 32 MiB scoped VMEM that is safe on v5e/v6e/v7x.
TILE_R_MAX = 512


def _detect_num_tensorcores() -> int:
    """Best-effort TensorCores-per-chip (v7x megacore = 2). Safe fallback = 2."""
    try:
        info = pltpu.get_tpu_info()
    except Exception:
        return 2
    for name in ("num_cores", "num_cores_per_chip", "core_count",
                 "tensorcores_per_chip", "num_tensorcores"):
        v = getattr(info, name, None)
        if isinstance(v, int) and not isinstance(v, bool) and 1 <= v <= 16:
            return v
    return 2


_NUM_TC = _detect_num_tensorcores()


def _pick_tile(n_pack: int) -> int:
    """Packed rows per grid step (must be a multiple of 8 or the full extent)."""
    if n_pack <= 8:
        return max(n_pack, 1)                 # full extent -> always legal
    if _NUM_TC >= 2 and n_pack <= 2 * TILE_R_MAX:
        # Two balanced steps so the "parallel" axis can shard across both TCs.
        half = (n_pack + 1) // 2
        return min(((half + 7) // 8) * 8, TILE_R_MAX)
    if n_pack <= TILE_R_MAX:
        return n_pack                          # single-TC chip: one big DMA burst
    return TILE_R_MAX


def _synth_kernel(x_ref, w_ref, b_ref, o_ref):
    # x_ref: (TILE, 2048) f32   128 packed tokens x 16 features per row
    # w_ref: (1, 2048)    f32   Linear weight tiled per lane (w[l % 16])
    # b_ref: (1, 1)       f32   bias scalar in SMEM
    # o_ref: (TILE, 128)  f32   sigmoid(linear) per packed token (lane-dense)
    #
    # 1) Apply the weight with one VPU multiply (hidden under the block DMA),
    #    then drop to bf16 so the MXU contraction is a single pass.
    xs = (x_ref[...] * w_ref[...]).astype(jnp.bfloat16)            # (TILE, 2048)
    # 2) 16 -> 1 segment-sum per token via a 0/1 selector built from iotas
    #    (never touches HBM; cheap VPU work hidden under the DMA; exact in bf16).
    row = jax.lax.broadcasted_iota(jnp.int32, (PACKED_W, PACK), 0)
    col16 = jax.lax.broadcasted_iota(jnp.int32, (PACKED_W, PACK), 1) * K
    sel = jnp.where((row >= col16) & (row < col16 + K), 1.0, 0.0)
    sel = sel.astype(jnp.bfloat16)                                  # (2048, 128)
    # 3) Single-pass bf16 MXU matmul, f32 accumulation.
    y = jnp.dot(xs, sel, preferred_element_type=jnp.float32)       # (TILE, 128)
    o_ref[...] = jax.nn.sigmoid(y + b_ref[0, 0]).astype(o_ref.dtype)


def _packed_forward(x2, w_row, b):
    """Kernel path for a 128-token-aligned, flattened (n_tok, K) f32 slab."""
    n_tok = x2.shape[0]
    n_pack = n_tok // PACK
    xp = x2.reshape(n_pack, PACKED_W)          # free view of row-major data

    tile_r = _pick_tile(n_pack)
    grid = (pl.cdiv(n_pack, tile_r),)

    w_vec = jnp.tile(w_row, PACK).reshape(1, PACKED_W)   # 8 KiB, fetched once
    b_smem = b.reshape(1, 1)

    out = pl.pallas_call(
        _synth_kernel,
        out_shape=jax.ShapeDtypeStruct((n_pack, PACK), jnp.float32),
        grid_spec=pltpu.PrefetchScalarGridSpec(
            num_scalar_prefetch=0,
            grid=grid,
            in_specs=[
                pl.BlockSpec((tile_r, PACKED_W), lambda i: (i, 0)),
                pl.BlockSpec((1, PACKED_W), lambda i: (0, 0)),       # grid-invariant
                pl.BlockSpec(memory_space=pltpu.MemorySpace.SMEM),   # bias scalar
            ],
            out_specs=pl.BlockSpec((tile_r, PACK), lambda i: (i, 0)),
        ),
        compiler_params=pltpu.CompilerParams(
            dimension_semantics=("parallel",),
            vmem_limit_bytes=32 * 1024 * 1024,
        ),
    )(xp, w_vec, b_smem)
    return out.reshape(n_tok)


@jax.jit
def audio_synthesizer(x, weight, bias):
    """x: [..., K]; weight: [1, K]; bias: [1]  ->  sigmoid(x @ w.T + b): [..., 1]."""
    lead_shape = x.shape[:-1]
    assert x.shape[-1] == K, f"expected feature dim {K}, got {x.shape[-1]}"
    n = math.prod(lead_shape) if lead_shape else 1

    x2 = x.reshape(n, K).astype(jnp.float32)
    w_row = weight.reshape(K).astype(jnp.float32)
    b = bias.reshape(()).astype(jnp.float32)

    n_main = (n // PACK) * PACK                 # 128-aligned prefix -> kernel
    rem = n - n_main                            # <=127-token tail -> plain JAX

    parts = []
    if n_main:
        x_main = x2 if rem == 0 else x2[:n_main]     # aligned case: no copy at all
        parts.append(_packed_forward(x_main, w_row, b))
    if rem:
        tail = x2[n_main:]
        parts.append(jax.nn.sigmoid(tail @ w_row + b))

    if not parts:                                # zero-sized input edge case
        y = jnp.zeros((0,), jnp.float32)
    elif len(parts) == 1:
        y = parts[0]
    else:
        y = jnp.concatenate(parts, axis=0)
    return y.reshape(*lead_shape, 1).astype(x.dtype)


if __name__ == "__main__":
    key = jax.random.PRNGKey(0)
    kx, kw, kb, kx2, kw2 = jax.random.split(key, 5)

    # --- Test 1: module-consistent init, 128-aligned token count --------------
    x = jax.random.normal(kx, (2, 4, 128, K), dtype=jnp.float32)        # 1024 tokens
    weight = 0.0001 * jax.random.normal(kw, (1, K), dtype=jnp.float32)  # N(0, 1e-4)
    bound = 1.0 / (K ** 0.5)
    bias = jax.random.uniform(kb, (1,), minval=-bound, maxval=bound,
                              dtype=jnp.float32)

    y = jax.block_until_ready(audio_synthesizer(x, weight, bias))
    ref = jax.nn.sigmoid(jnp.einsum("...k,ok->...o", x, weight) + bias)
    assert y.shape == (2, 4, 128, 1), y.shape
    err = float(jnp.max(jnp.abs(y - ref)))
    assert err < 1e-5, err

    # --- Test 2: larger weights + ragged (non-multiple-of-128) token count ----
    x2 = jax.random.normal(kx2, (2, 4, 520, K), dtype=jnp.float32)      # 4160 tokens
    w2 = 0.1 * jax.random.normal(kw2, (1, K), dtype=jnp.float32)
    y2 = jax.block_until_ready(audio_synthesizer(x2, w2, bias))
    ref2 = jax.nn.sigmoid(jnp.einsum("...k,ok->...o", x2, w2) + bias)
    assert y2.shape == (2, 4, 520, 1), y2.shape
    err2 = float(jnp.max(jnp.abs(y2 - ref2)))
    assert err2 < 1e-2, err2   # bf16 MXU operands -> ~1e-3-level abs error here

    print("KERNEL_OK")
</pallas_src>

<mosaic_0001>
module attributes {stable_mosaic.version = 11 : i64} {
  func.func @_synth_kernel(%arg0: i32, %arg1: memref<8x2048xf32, #tpu.memory_space<vmem>>, %arg2: memref<1x2048xf32, #tpu.memory_space<vmem>>, %arg3: memref<1x1xf32, #tpu.memory_space<smem>>, %arg4: memref<8x128xf32, #tpu.memory_space<vmem>>) attributes {dimension_semantics = [#tpu.dimension_semantics<parallel>], iteration_bounds = array<i64: 1>, scalar_prefetch = 0 : i64, scratch_operands = 0 : i64, tpu.core_type = #tpu.core_type<tc>, window_params = [{transform_indices = @transform_0, window_bounds = array<i64: 8, 2048>}, {pipeline_mode = #tpu.pipeline_mode<synchronous>, transform_indices = @transform_1, window_bounds = array<i64: 1, 2048>}, {transform_indices = @transform_2, window_bounds = array<i64: 1, 1>}, {transform_indices = @transform_3, window_bounds = array<i64: 8, 128>}]} {
    %c0 = arith.constant 0 : index
    %c0_0 = arith.constant 0 : index
    %0 = vector.load %arg1[%c0, %c0_0] : memref<8x2048xf32, #tpu.memory_space<vmem>>, vector<8x2048xf32>
    %c0_1 = arith.constant 0 : index
    %c0_2 = arith.constant 0 : index
    %1 = vector.load %arg2[%c0_1, %c0_2] : memref<1x2048xf32, #tpu.memory_space<vmem>>, vector<1x2048xf32>
    %2 = vector.broadcast %1 : vector<1x2048xf32> to vector<8x2048xf32>
    %3 = arith.mulf %0, %2 : vector<8x2048xf32>
    %4 = arith.truncf %3 : vector<8x2048xf32> to vector<8x2048xbf16>
    %5 = tpu.iota {dimensions = array<i32: 0>} : vector<2048x128xi32>
    %6 = tpu.iota {dimensions = array<i32: 1>} : vector<2048x128xi32>
    %c16_i32 = arith.constant 16 : i32
    %7 = vector.broadcast %c16_i32 : i32 to vector<2048x128xi32>
    %8 = arith.muli %6, %7 : vector<2048x128xi32>
    %9 = arith.cmpi sge, %5, %8 : vector<2048x128xi32>
    %c16_i32_3 = arith.constant 16 : i32
    %10 = vector.broadcast %c16_i32_3 : i32 to vector<2048x128xi32>
    %11 = arith.addi %8, %10 : vector<2048x128xi32>
    %12 = arith.cmpi slt, %5, %11 : vector<2048x128xi32>
    %13 = arith.andi %9, %12 : vector<2048x128xi1>
    %cst = arith.constant 1.000000e+00 : f32
    %cst_4 = arith.constant 0.000000e+00 : f32
    %14 = vector.broadcast %cst : f32 to vector<2048x128xf32>
    %15 = vector.broadcast %cst_4 : f32 to vector<2048x128xf32>
    %16 = arith.select %13, %14, %15 : vector<2048x128xi1>, vector<2048x128xf32>
    %17 = arith.truncf %16 : vector<2048x128xf32> to vector<2048x128xbf16>
    %cst_5 = arith.constant dense<0.000000e+00> : vector<8x128xf32>
    %18 = tpu.matmul %4, %17, %cst_5 {dimension_numbers = #tpu.dot_dimension_numbers<[1], [0], [0], [1], [0, 0, 1, 1], [], []>} : vector<8x2048xbf16>, vector<2048x128xbf16>, vector<8x128xf32> -> vector<8x128xf32>
    %c0_6 = arith.constant 0 : index
    %c0_7 = arith.constant 0 : index
    %19 = memref.load %arg3[%c0_6, %c0_7] : memref<1x1xf32, #tpu.memory_space<smem>>
    %20 = vector.broadcast %19 : f32 to vector<8x128xf32>
    %21 = arith.addf %18, %20 : vector<8x128xf32>
    %22 = arith.negf %21 : vector<8x128xf32>
    %23 = math.exp %22 : vector<8x128xf32>
    %cst_8 = arith.constant 1.000000e+00 : f32
    %24 = vector.broadcast %cst_8 : f32 to vector<8x128xf32>
    %25 = arith.addf %24, %23 : vector<8x128xf32>
    %26 = arith.divf %24, %25 : vector<8x128xf32>
    %c0_9 = arith.constant 0 : index
    %c0_10 = arith.constant 0 : index
    %27 = vector.load %arg4[%c0_9, %c0_10] : memref<8x128xf32, #tpu.memory_space<vmem>>, vector<8x128xf32>
    tpu.vector_store %arg4[%c0_9, %c0_10], %26 {strides = array<i32>} : memref<8x128xf32, #tpu.memory_space<vmem>>, vector<8x128xf32>,
    return
  }
  func.func @transform_0(%arg0: i32) -> (i32, i32) {
    %c0_i32 = arith.constant 0 : i32
    %c0_i32_0 = arith.constant 0 : i32
    return %arg0, %c0_i32 : i32, i32
  }
  func.func @transform_1(%arg0: i32) -> (i32, i32) {
    %c0_i32 = arith.constant 0 : i32
    %c0_i32_0 = arith.constant 0 : i32
    %c0_i32_1 = arith.constant 0 : i32
    return %c0_i32, %c0_i32_0 : i32, i32
  }
  func.func @transform_2(%arg0: i32) -> (i32, i32) {
    %c0_i32 = arith.constant 0 : i32
    %c0_i32_0 = arith.constant 0 : i32
    %c0_i32_1 = arith.constant 0 : i32
    return %c0_i32, %c0_i32_0 : i32, i32
  }
  func.func @transform_3(%arg0: i32) -> (i32, i32) {
    %c0_i32 = arith.constant 0 : i32
    %c0_i32_0 = arith.constant 0 : i32
    return %arg0, %c0_i32 : i32, i32
  }
}

</mosaic_0001>

<bundles_post_ra>
// kernel: tile.6
= control target key start
LH: loop header
LB: loop body
LE: loop exit
PB: predicated region body
PF: predicated region fallthrough
CT: control target
= control target key end

     0   :  { %s112_s0 = inlined_call_operand.vmem [shape: f32[16], index: 0, kind: input, shape index: {}]   ;;  %s113_s1 = inlined_call_operand.vmem [shape: f32[128,16], index: 1, kind: output, shape index: {}]  }
   0x1   :  { %v4_v0 = vld [vmem:[%s112_s0] ss:$0 sm:$0xff] }
   0x2   :  { %5 = vst [vmem:[%s113_s1] sm:$0xff] %v4_v0  ;;  %36 = vst [vmem:[%s113_s1 + $0x8] sm:$0xff] %v4_v0 }
   0x3   :  { %37 = vst [vmem:[%s113_s1 + $0x10] sm:$0xff] %v4_v0  ;;  %38 = vst [vmem:[%s113_s1 + $0x18] sm:$0xff] %v4_v0 }
   0x4   :  { %39 = vst [vmem:[%s113_s1 + $0x20] sm:$0xff] %v4_v0  ;;  %40 = vst [vmem:[%s113_s1 + $0x28] sm:$0xff] %v4_v0 }
   0x5   :  { %41 = vst [vmem:[%s113_s1 + $0x30] sm:$0xff] %v4_v0  ;;  %42 = vst [vmem:[%s113_s1 + $0x38] sm:$0xff] %v4_v0 }
   0x6   :  { %43 = vst [vmem:[%s113_s1 + $0x40] sm:$0xff] %v4_v0  ;;  %44 = vst [vmem:[%s113_s1 + $0x48] sm:$0xff] %v4_v0 }
   0x7   :  { %45 = vst [vmem:[%s113_s1 + $0x50] sm:$0xff] %v4_v0  ;;  %46 = vst [vmem:[%s113_s1 + $0x58] sm:$0xff] %v4_v0 }
   0x8   :  { %47 = vst [vmem:[%s113_s1 + $0x60] sm:$0xff] %v4_v0  ;;  %48 = vst [vmem:[%s113_s1 + $0x68] sm:$0xff] %v4_v0 }
   0x9   :  { %49 = vst [vmem:[%s113_s1 + $0x70] sm:$0xff] %v4_v0  ;;  %50 = vst [vmem:[%s113_s1 + $0x78] sm:$0xff] %v4_v0 }

// kernel: tile.7
= control target key start
LH: loop header
LB: loop body
LE: loop exit
PB: predicated region body
PF: predicated region fallthrough
CT: control target
= control target key end

     0   :  { %vm4_vm0 = vcmask 1047556   ;;  %s349_s16 = smov 96   ;;  %s350_s21 = smov 112   ;;  %vm6_vm1 = vcmask 130048   ;;  %vm28_vm2 = vcmask 1048448   ;;  %vm52_vm3 = vcmask 917248   ;;  %s530_s0 = inlined_call_operand.vmem [shape: f32[128,16], index: 0, kind: input, shape index: {}]   ;;  %s531_s1 = inlined_call_operand.vmem [shape: f32[1,2048], index: 1, kind: output, shape index: {}]  }
   0x1   :  { %v303_v0 = vld [vmem:[%s530_s0 + $0x6] ss:$8 sm:$0xf]   ;;  %v299_v2 = vld [vmem:[%s530_s0 + $0x7] ss:$8 sm:$0xf]  }
   0x2   :  { %v304_v1 = vld [vmem:[%s530_s0 + $0x6] ss:$8 sm:$0xf0]   ;;  %v300_v4 = vld [vmem:[%s530_s0 + $0x7] ss:$8 sm:$0xf0]  }
   0x3   :  { %v49_v3 = vsel %vm4_vm0, %v304_v1, %v303_v0  ;;  %v305_v5 = vld [vmem:[%s530_s0 + $0x46] ss:$8 sm:$0xf]   ;;  %v25_v6 = vsel %vm4_vm0, %v300_v4, %v299_v2  ;;  %v301_v8 = vld [vmem:[%s530_s0 + $0x47] ss:$8 sm:$0xf]  }
   0x4   :  { %50 = vrot.lane.b32.xlu1 %v49_v3, %s349_s16  ;;  %v306_v7 = vld [vmem:[%s530_s0 + $0x46] ss:$8 sm:$0xf0]   ;;  %26 = vrot.lane.b32.xlu0 %v25_v6, %s350_s21  ;;  %v302_v10 = vld [vmem:[%s530_s0 + $0x47] ss:$8 sm:$0xf0]  }
   0x5   :  { %v60_v9 = vsel %vm4_vm0, %v306_v7, %v305_v5  ;;  %v36_v11 = vsel %vm4_vm0, %v302_v10, %v301_v8  ;;  %v309_v12 = vld [vmem:[%s530_s0 + $0x45] ss:$8 sm:$0xf]   ;;  %v313_v18 = vld [vmem:[%s530_s0 + $0x44] ss:$8 sm:$0xf]  }
   0x6   :  { %v310_v13 = vld [vmem:[%s530_s0 + $0x45] ss:$8 sm:$0xf0]   ;;  %v314_v19 = vld [vmem:[%s530_s0 + $0x44] ss:$8 sm:$0xf0]  }
   0x7   :  { %v307_v14 = vld [vmem:[%s530_s0 + $0x5] ss:$8 sm:$0xf]   ;;  %v84_v16 = vsel %vm4_vm0, %v310_v13, %v309_v12  ;;  %v311_v20 = vld [vmem:[%s530_s0 + $0x4] ss:$8 sm:$0xf]   ;;  %v108_v22 = vsel %vm4_vm0, %v314_v19, %v313_v18 }
   0x8   :  { %v308_v15 = vld [vmem:[%s530_s0 + $0x5] ss:$8 sm:$0xf0]   ;;  %61 = vrot.lane.b32.xlu1 %v60_v9, %s349_s16  ;;  %37 = vrot.lane.b32.xlu0 %v36_v11, %s350_s21  ;;  %v312_v21 = vld [vmem:[%s530_s0 + $0x4] ss:$8 sm:$0xf0]  }
   0x9   :  { %v73_v17 = vsel %vm4_vm0, %v308_v15, %v307_v14  ;;  %s351_s11 = smov 80   ;;  %v317_v23 = vld [vmem:[%s530_s0 + $0x43] ss:$8 sm:$0xf]   ;;  %v97_v24 = vsel %vm4_vm0, %v312_v21, %v311_v20  ;;  %s352_s20 = smov 64   ;;  %vm76_vm4 = vcmask 786048  }
   0xa   :  { %v318_v25 = vld [vmem:[%s530_s0 + $0x43] ss:$8 sm:$0xf0]   ;;  %v321_v28 = vld [vmem:[%s530_s0 + $0x42] ss:$8 sm:$0xf]  }
   0xb   :  { %v315_v26 = vld [vmem:[%s530_s0 + $0x3] ss:$8 sm:$0xf]   ;;  %v322_v29 = vld [vmem:[%s530_s0 + $0x42] ss:$8 sm:$0xf0]   ;;  %v132_v30 = vsel %vm4_vm0, %v318_v25, %v317_v23 }
   0xc   :  { %85 = vrot.lane.b32.xlu1 %v84_v16, %s351_s11  ;;  %74 = vrot.lane.b32.xlu0 %v73_v17, %s351_s11  ;;  %v316_v27 = vld [vmem:[%s530_s0 + $0x3] ss:$8 sm:$0xf0]   ;;  %v2_v31 = vld [vmem:[%s530_s0] ss:$8 sm:$0xf]   ;;  %v156_v40 = vsel %vm4_vm0, %v322_v29, %v321_v28 }
   0xd   :  { %v3_v32 = vld [vmem:[%s530_s0] ss:$8 sm:$0xf0]   ;;  %v121_v33 = vsel %vm4_vm0, %v316_v27, %v315_v26  ;;  %v319_v37 = vld [vmem:[%s530_s0 + $0x2] ss:$8 sm:$0xf]  }
   0xe   :  { %v5_v34 = vsel %vm4_vm0, %v3_v32, %v2_v31  ;;  %v297_v35 = vld [vmem:[%s530_s0 + $0x40] ss:$8 sm:$0xf]   ;;  %v320_v38 = vld [vmem:[%s530_s0 + $0x2] ss:$8 sm:$0xf0]  }
   0xf   :  { %v298_v36 = vld [vmem:[%s530_s0 + $0x40] ss:$8 sm:$0xf0]   ;;  %7 = vst.msk [vmem:[#allocation0] ss:$8 sm:$0xf] %vm6_vm1, %v5_v34   ;;  %v145_v41 = vsel %vm4_vm0, %v320_v38, %v319_v37 }
  0x10   :  { %109 = vrot.lane.b32.xlu1 %v108_v22, %s352_s20  ;;  %98 = vrot.lane.b32.xlu0 %v97_v24, %s352_s20  ;;  %8 = vst.msk [vmem:[#allocation0] ss:$8 sm:$0xf0] %vm6_vm1, %v5_v34   ;;  %v14_v39 = vsel %vm4_vm0, %v298_v36, %v297_v35  ;;  %s353_s8 = smov 48   ;;  %s355_s17 = smov 16   ;;  %vm100_vm5 = vcmask 654848  }
  0x11   :  { %17 = vst.msk [vmem:[#allocation0 + $0x40] ss:$8 sm:$0xf] %vm6_vm1, %v14_v39   ;;  %19 = vst.msk [vmem:[#allocation0 + $0x40] ss:$8 sm:$0xf0] %vm6_vm1, %v14_v39  }
  0x12   :  { %v325_v42 = vld [vmem:[%s530_s0 + $0x41] ss:$8 sm:$0xf]   ;;  %vm124_vm6 = vcmask 523648   ;;  %vm148_vm7 = vcmask 392448   ;;  %vm172_vm8 = vcmask 261248  }
  0x13   :  { %v326_v43 = vld [vmem:[%s530_s0 + $0x41] ss:$8 sm:$0xf0]  }
  0x14   :  { %133 = vrot.lane.b32.xlu1 %v132_v30, %s353_s8  ;;  %122 = vrot.lane.b32.xlu0 %v121_v33, %s353_s8  ;;  %v323_v44 = vld [vmem:[%s530_s0 + $0x1] ss:$8 sm:$0xf]   ;;  %v180_v46 = vsel %vm4_vm0, %v326_v43, %v325_v42 }
  0x15   :  { %v324_v45 = vld [vmem:[%s530_s0 + $0x1] ss:$8 sm:$0xf0]   ;;  %s354_s0 = smov 32  }
  0x16   :  { %v169_v47 = vsel %vm4_vm0, %v324_v45, %v323_v44 }
  0x18   :  { %157 = vrot.lane.b32.xlu1 %v156_v40, %s354_s0  ;;  %146 = vrot.lane.b32.xlu0 %v145_v41, %s354_s0 }
  0x1c   :  { %181 = vrot.lane.b32.xlu1 %v180_v46, %s355_s17  ;;  %170 = vrot.lane.b32.xlu0 %v169_v47, %s355_s17 }
  0x76   :  { %v51_v48 = vpop.permute.xlu1 %50   ;;  %v27_v49 = vpop.permute.xlu0 %26  }
  0x77   :  { %29 = vst.msk [vmem:[#allocation0] ss:$8 sm:$0xf] %vm28_vm2, %v27_v49   ;;  %30 = vst.msk [vmem:[#allocation0] ss:$8 sm:$0xf0] %vm28_vm2, %v27_v49  }
  0x78   :  { %53 = vst.msk [vmem:[#allocation0] ss:$8 sm:$0xf] %vm52_vm3, %v51_v48   ;;  %54 = vst.msk [vmem:[#allocation0] ss:$8 sm:$0xf0] %vm52_vm3, %v51_v48  }
  0x7a   :  { %v62_v50 = vpop.permute.xlu1 %61   ;;  %v38_v51 = vpop.permute.xlu0 %37  }
  0x7b   :  { %41 = vst.msk [vmem:[#allocation0 + $0x40] ss:$8 sm:$0xf] %vm28_vm2, %v38_v51   ;;  %43 = vst.msk [vmem:[#allocation0 + $0x40] ss:$8 sm:$0xf0] %vm28_vm2, %v38_v51  }
  0x7c   :  { %65 = vst.msk [vmem:[#allocation0 + $0x40] ss:$8 sm:$0xf] %vm52_vm3, %v62_v50   ;;  %67 = vst.msk [vmem:[#allocation0 + $0x40] ss:$8 sm:$0xf0] %vm52_vm3, %v62_v50  }
  0x7e   :  { %v86_v52 = vpop.permute.xlu1 %85   ;;  %v75_v53 = vpop.permute.xlu0 %74  }
  0x7f   :  { %89 = vst.msk [vmem:[#allocation0 + $0x40] ss:$8 sm:$0xf] %vm76_vm4, %v86_v52   ;;  %91 = vst.msk [vmem:[#allocation0 + $0x40] ss:$8 sm:$0xf0] %vm76_vm4, %v86_v52  }
  0x80   :  { %77 = vst.msk [vmem:[#allocation0] ss:$8 sm:$0xf] %vm76_vm4, %v75_v53   ;;  %78 = vst.msk [vmem:[#allocation0] ss:$8 sm:$0xf0] %vm76_vm4, %v75_v53  }
  0x82   :  { %v110_v54 = vpop.permute.xlu1 %109   ;;  %v99_v55 = vpop.permute.xlu0 %98  }
  0x83   :  { %113 = vst.msk [vmem:[#allocation0 + $0x40] ss:$8 sm:$0xf] %vm100_vm5, %v110_v54   ;;  %115 = vst.msk [vmem:[#allocation0 + $0x40] ss:$8 sm:$0xf0] %vm100_vm5, %v110_v54  }
  0x84   :  { %101 = vst.msk [vmem:[#allocation0] ss:$8 sm:$0xf] %vm100_vm5, %v99_v55   ;;  %102 = vst.msk [vmem:[#allocation0] ss:$8 sm:$0xf0] %vm100_vm5, %v99_v55  }
  0x86   :  { %v134_v56 = vpop.permute.xlu1 %133   ;;  %v123_v57 = vpop.permute.xlu0 %122  }
  0x87   :  { %137 = vst.msk [vmem:[#allocation0 + $0x40] ss:$8 sm:$0xf] %vm124_vm6, %v134_v56   ;;  %139 = vst.msk [vmem:[#allocation0 + $0x40] ss:$8 sm:$0xf0] %vm124_vm6, %v134_v56  }
  0x88   :  { %125 = vst.msk [vmem:[#allocation0] ss:$8 sm:$0xf] %vm124_vm6, %v123_v57   ;;  %126 = vst.msk [vmem:[#allocation0] ss:$8 sm:$0xf0] %vm124_vm6, %v123_v57  }
  0x8a   :  { %v158_v58 = vpop.permute.xlu1 %157   ;;  %v147_v59 = vpop.permute.xlu0 %146  }
  0x8b   :  { %161 = vst.msk [vmem:[#allocation0 + $0x40] ss:$8 sm:$0xf] %vm148_vm7, %v158_v58   ;;  %163 = vst.msk [vmem:[#allocation0 + $0x40] ss:$8 sm:$0xf0] %vm148_vm7, %v158_v58  }
  0x8c   :  { %149 = vst.msk [vmem:[#allocation0] ss:$8 sm:$0xf] %vm148_vm7, %v147_v59   ;;  %150 = vst.msk [vmem:[#allocation0] ss:$8 sm:$0xf0] %vm148_vm7, %v147_v59  }
  0x8e   :  { %v182_v60 = vpop.permute.xlu1 %181   ;;  %v171_v61 = vpop.permute.xlu0 %170  }
  0x8f   :  { %185 = vst.msk [vmem:[#allocation0 + $0x40] ss:$8 sm:$0xf] %vm172_vm8, %v182_v60   ;;  %187 = vst.msk [vmem:[#allocation0 + $0x40] ss:$8 sm:$0xf0] %vm172_vm8, %v182_v60  }
  0x90   :  { %173 = vst.msk [vmem:[#allocation0] ss:$8 sm:$0xf] %vm172_vm8, %v171_v61   ;;  %174 = vst.msk [vmem:[#allocation0] ss:$8 sm:$0xf0] %vm172_vm8, %v171_v61  }
  0x96   :  { %v236_v62 = vld [vmem:[#allocation0 + $0x40] sm:$0x1]  ;;  %v242_v63 = vld [vmem:[#allocation0 + $0x48] sm:$0x1]  ;;  %v248_v0 = vld [vmem:[#allocation0 + $0x50] sm:$0x1] }
  0x97   :  { %334 = vst [vmem:[%s531_s1 + $0x8] sm:$0x1] %v236_v62  ;;  %335 = vst [vmem:[%s531_s1 + $0x9] sm:$0x1] %v242_v63  ;;  %v254_v1 = vld [vmem:[#allocation0 + $0x58] sm:$0x1] }
  0x98   :  { %336 = vst [vmem:[%s531_s1 + $0xa] sm:$0x1] %v248_v0  ;;  %v260_v2 = vld [vmem:[#allocation0 + $0x60] sm:$0x1]  ;;  %v266_v3 = vld [vmem:[#allocation0 + $0x68] sm:$0x1] }
  0x99   :  { %337 = vst [vmem:[%s531_s1 + $0xb] sm:$0x1] %v254_v1  ;;  %338 = vst [vmem:[%s531_s1 + $0xc] sm:$0x1] %v260_v2  ;;  %v272_v4 = vld [vmem:[#allocation0 + $0x70] sm:$0x1] }
  0x9a   :  { %339 = vst [vmem:[%s531_s1 + $0xd] sm:$0x1] %v266_v3  ;;  %v278_v5 = vld [vmem:[#allocation0 + $0x78] sm:$0x1]  ;;  %v191_v6 = vld [vmem:[#allocation0] sm:$0x1] }
  0x9b   :  { %340 = vst [vmem:[%s531_s1 + $0xe] sm:$0x1] %v272_v4  ;;  %341 = vst [vmem:[%s531_s1 + $0xf] sm:$0x1] %v278_v5  ;;  %v195_v7 = vld [vmem:[#allocation0 + $0x8] sm:$0x1] }
  0x9c   :  { %193 = vst [vmem:[%s531_s1] sm:$0x1] %v191_v6  ;;  %v200_v8 = vld [vmem:[#allocation0 + $0x10] sm:$0x1]  ;;  %v206_v9 = vld [vmem:[#allocation0 + $0x18] sm:$0x1] }
  0x9d   :  { %327 = vst [vmem:[%s531_s1 + $0x1] sm:$0x1] %v195_v7  ;;  %328 = vst [vmem:[%s531_s1 + $0x2] sm:$0x1] %v200_v8  ;;  %v212_v10 = vld [vmem:[#allocation0 + $0x20] sm:$0x1] }
  0x9e   :  { %329 = vst [vmem:[%s531_s1 + $0x3] sm:$0x1] %v206_v9  ;;  %v218_v11 = vld [vmem:[#allocation0 + $0x28] sm:$0x1]  ;;  %v224_v12 = vld [vmem:[#allocation0 + $0x30] sm:$0x1] }
  0x9f   :  { %330 = vst [vmem:[%s531_s1 + $0x4] sm:$0x1] %v212_v10  ;;  %331 = vst [vmem:[%s531_s1 + $0x5] sm:$0x1] %v218_v11  ;;  %v230_v13 = vld [vmem:[#allocation0 + $0x38] sm:$0x1] }
  0xa0   :  { %332 = vst [vmem:[%s531_s1 + $0x6] sm:$0x1] %v224_v12  ;;  %333 = vst [vmem:[%s531_s1 + $0x7] sm:$0x1] %v230_v13 }

// kernel: audio_synthesizer.1
= control target key start
LH: loop header
LB: loop body
LE: loop exit
PB: predicated region body
PF: predicated region fallthrough
CT: control target
= control target key end

     0   :  { %v37_v0 = vlaneseq  ;;  %s3475_s0 = inlined_call_operand.vmem [shape: f32[8,2048], index: 0, kind: input, shape index: {}]   ;;  %s3476_s1 = inlined_call_operand.vmem [shape: f32[1,2048], index: 1, kind: input, shape index: {}]   ;;  %s3477_s2 = inlined_call_operand.<no memory space> [shape: f32[1,1], index: 2, kind: input, shape index: {}]   ;;  %s3478_s3 = inlined_call_operand.hbm [shape: f32[8,128], index: 3, kind: output, shape index: {}]  }
   0x1   :  { %9 = vsyncpa [#allocation4], 0  ;;  %v2370_v11 = vmov 1.0|1.0   ;;  %v2509_v38 = vld [vmem:[%s3476_s1] sm:$0xff]  ;;  %v18_v41 = vld [vmem:[%s3475_s0 + $0x8] sm:$0xff] }
   0x2   :  { %v2392_v1 = vshrl.u32 %v37_v0, 7  ;;  %v407_v2 = vand.u32 127, %v37_v0  ;;  %v20_v45 = vld [vmem:[%s3475_s0 + $0x18] sm:$0xff] }
   0x4   :  { %v166_v3 = vadd.s32 128, %v2392_v1  ;;  %v167_v4 = vadd.s32 136, %v2392_v1  ;;  %v2396_v5 = vmul.u32 16, %v407_v2  ;;  %v198_v6 = vadd.s32 384, %v2392_v1 }
   0x5   :  { %v199_v8 = vadd.s32 392, %v2392_v1  ;;  %v151_v9 = vadd.s32 8, %v2392_v1  ;;  %v182_v10 = vadd.s32 256, %v2392_v1  ;;  %v183_v12 = vadd.s32 264, %v2392_v1 }
   0x6   :  { %vm425_vm0 = vcmp.ge.s32.totalorder %v166_v3, %v2396_v5  ;;  %v2401_v7 = vadd.s32 16, %v2396_v5  ;;  %vm426_vm1 = vcmp.ge.s32.totalorder %v167_v4, %v2396_v5  ;;  %vm457_vm5 = vcmp.ge.s32.totalorder %v198_v6, %v2396_v5 }
   0x7   :  { %vm458_vm8 = vcmp.ge.s32.totalorder %v199_v8, %v2396_v5  ;;  %vm409_vm12 = vcmp.ge.s32.totalorder %v2392_v1, %v2396_v5  ;;  %vm410_vm15 = vcmp.ge.s32.totalorder %v151_v9, %v2396_v5  ;;  %v168_v13 = vadd.s32 144, %v2392_v1 }
   0x8   :  { %vm682_vm2 = vcmp.lt.s32.totalorder %v166_v3, %v2401_v7  ;;  %vm683_vm3 = vcmp.lt.s32.totalorder %v167_v4, %v2401_v7  ;;  %vm714_vm6 = vcmp.lt.s32.totalorder %v198_v6, %v2401_v7  ;;  %vm715_vm9 = vcmp.lt.s32.totalorder %v199_v8, %v2401_v7 }
   0x9   :  { %vm938_vm4 = vmand %vm425_vm0, %vm682_vm2  ;;  %vm666_vm13 = vcmp.lt.s32.totalorder %v2392_v1, %v2401_v7  ;;  %vm667_vm0 = vcmp.lt.s32.totalorder %v151_v9, %v2401_v7  ;;  %v169_v14 = vadd.s32 152, %v2392_v1  ;;  %v200_v15 = vadd.s32 400, %v2392_v1 }
   0xa   :  { %vm939_vm7 = vmand %vm426_vm1, %vm683_vm3  ;;  %vm441_vm3 = vcmp.ge.s32.totalorder %v182_v10, %v2396_v5  ;;  %v201_v16 = vadd.s32 408, %v2392_v1  ;;  %v152_v17 = vadd.s32 16, %v2392_v1  ;;  %v153_v18 = vadd.s32 24, %v2392_v1 }
   0xb   :  { %vm1921_vm10 = vmpackc.low %vm939_vm7, %vm938_vm4  ;;  %vm698_vm4 = vcmp.lt.s32.totalorder %v182_v10, %v2401_v7  ;;  %vm699_vm7 = vcmp.lt.s32.totalorder %v183_v12, %v2401_v7  ;;  %v184_v19 = vadd.s32 272, %v2392_v1  ;;  %v185_v20 = vadd.s32 280, %v2392_v1 }
   0xc   :  { %2162 = vmatprep.subr.msk.bf16.mxu0 %vm1921_vm10, %v2370_v11  ;;  %vm970_vm11 = vmand %vm457_vm5, %vm714_vm6  ;;  %vm442_vm6 = vcmp.ge.s32.totalorder %v183_v12, %v2396_v5  ;;  %vm427_vm10 = vcmp.ge.s32.totalorder %v168_v13, %v2396_v5  ;;  %v170_v21 = vadd.s32 160, %v2392_v1  ;;  %v171_v22 = vadd.s32 168, %v2392_v1 }
   0xd   :  { %vm971_vm14 = vmand %vm458_vm8, %vm715_vm9  ;;  %v202_v23 = vadd.s32 416, %v2392_v1  ;;  %v203_v24 = vadd.s32 424, %v2392_v1  ;;  %v154_v25 = vadd.s32 32, %v2392_v1  ;;  %v155_v26 = vadd.s32 40, %v2392_v1 }
   0xe   :  { %vm1953_vm1 = vmpackc.low %vm971_vm14, %vm970_vm11  ;;  %vm684_vm11 = vcmp.lt.s32.totalorder %v168_v13, %v2401_v7  ;;  %vm685_vm14 = vcmp.lt.s32.totalorder %v169_v14, %v2401_v7  ;;  %v186_v27 = vadd.s32 288, %v2392_v1  ;;  %v187_v28 = vadd.s32 296, %v2392_v1 }
   0xf   :  { %2184 = vmatprep.subr.msk.bf16.mxu1 %vm1953_vm1, %v2370_v11  ;;  %vm922_vm2 = vmand %vm409_vm12, %vm666_vm13  ;;  %vm428_vm13 = vcmp.ge.s32.totalorder %v169_v14, %v2396_v5  ;;  %vm459_vm1 = vcmp.ge.s32.totalorder %v200_v15, %v2396_v5  ;;  %v172_v29 = vadd.s32 176, %v2392_v1  ;;  %v173_v30 = vadd.s32 184, %v2392_v1 }
  0x10   :  { %vm923_vm5 = vmand %vm410_vm15, %vm667_vm0  ;;  %v204_v31 = vadd.s32 432, %v2392_v1  ;;  %v205_v32 = vadd.s32 440, %v2392_v1  ;;  %v156_v33 = vadd.s32 48, %v2392_v1  ;;  %v157_v34 = vadd.s32 56, %v2392_v1 }
  0x11   :  { %vm1905_vm8 = vmpackc.low %vm923_vm5, %vm922_vm2  ;;  %vm716_vm2 = vcmp.lt.s32.totalorder %v200_v15, %v2401_v7  ;;  %vm717_vm5 = vcmp.lt.s32.totalorder %v201_v16, %v2401_v7  ;;  %v188_v35 = vadd.s32 304, %v2392_v1  ;;  %v189_v36 = vadd.s32 312, %v2392_v1 }
  0x12   :  { %2163 = vmatpush3.bf16.msk.msra.mxu0 %vm1905_vm8, %v2370_v11  ;;  %vm954_vm9 = vmand %vm441_vm3, %vm698_vm4  ;;  %vm460_vm4 = vcmp.ge.s32.totalorder %v201_v16, %v2396_v5  ;;  %vm411_vm8 = vcmp.ge.s32.totalorder %v152_v17, %v2396_v5  ;;  %v174_v37 = vadd.s32 192, %v2392_v1  ;;  %v175_v39 = vadd.s32 200, %v2392_v1 }
  0x13   :  { %vm955_vm12 = vmand %vm442_vm6, %vm699_vm7  ;;  %v43_v40 = vsub.s32 1, %v2392_v1  ;;  %v51_v42 = vsub.s32 3, %v2392_v1  ;;  %v206_v43 = vadd.s32 448, %v2392_v1  ;;  %v207_v46 = vadd.s32 456, %v2392_v1 }
  0x14   :  { %vm1937_vm15 = vmpackc.low %vm955_vm12, %vm954_vm9  ;;  %vm668_vm9 = vcmp.lt.s32.totalorder %v152_v17, %v2401_v7  ;;  %vm669_vm12 = vcmp.lt.s32.totalorder %v153_v18, %v2401_v7  ;;  %v158_v49 = vadd.s32 64, %v2392_v1  ;;  %v159_v51 = vadd.s32 72, %v2392_v1 }
  0x15   :  { %2185 = vmatpush3.bf16.msk.msra.mxu1 %vm1937_vm15, %v2370_v11  ;;  %vm940_vm0 = vmand %vm427_vm10, %vm684_vm11  ;;  %vm412_vm11 = vcmp.ge.s32.totalorder %v153_v18, %v2396_v5  ;;  %vm443_vm15 = vcmp.ge.s32.totalorder %v184_v19, %v2396_v5  ;;  %v44_v44 = vrot.slane %v2509_v38, %v43_v40  ;;  %v52_v47 = vrot.slane %v2509_v38, %v51_v42 }
  0x16   :  { %vm941_vm3 = vmand %vm428_vm13, %vm685_vm14  ;;  %v190_v54 = vadd.s32 320, %v2392_v1  ;;  %v191_v55 = vadd.s32 328, %v2392_v1  ;;  %v176_v56 = vadd.s32 208, %v2392_v1  ;;  %v177_v57 = vadd.s32 216, %v2392_v1 }
  0x17   :  { %vm1923_vm6 = vmpackc.low %vm941_vm3, %vm940_vm0  ;;  %vm700_vm0 = vcmp.lt.s32.totalorder %v184_v19, %v2401_v7  ;;  %vm701_vm3 = vcmp.lt.s32.totalorder %v185_v20, %v2401_v7  ;;  %v118_v48 = vmul.f32 %v44_v44, %v18_v41  ;;  %v120_v50 = vmul.f32 %v52_v47, %v20_v45  ;;  %v24_v41 = vld [vmem:[%s3475_s0 + $0x38] sm:$0xff] }
  0x18   :  { %2164 = vmatprep.subr.msk.bf16.mxu0 %vm1923_vm6, %v2370_v11  ;;  %vm972_vm7 = vmand %vm459_vm1, %vm716_vm2  ;;  %vm444_vm2 = vcmp.ge.s32.totalorder %v185_v20, %v2396_v5  ;;  %vm429_vm6 = vcmp.ge.s32.totalorder %v170_v21, %v2396_v5  ;;  %v208_v58 = vadd.s32 464, %v2392_v1  ;;  %v209_v59 = vadd.s32 472, %v2392_v1 }
  0x19   :  { %vm973_vm10 = vmand %vm460_vm4, %vm717_vm5  ;;  %v134_v52 = vpack.c.bf16 %v118_v48, %v118_v48  ;;  %v136_v53 = vpack.c.bf16 %v120_v50, %v120_v50  ;;  %v160_v60 = vadd.s32 80, %v2392_v1  ;;  %v161_v61 = vadd.s32 88, %v2392_v1 }
  0x1a   :  { %vm1955_vm13 = vmpackc.low %vm973_vm10, %vm972_vm7  ;;  %vm686_vm7 = vcmp.lt.s32.totalorder %v170_v21, %v2401_v7  ;;  %vm687_vm10 = vcmp.lt.s32.totalorder %v171_v22, %v2401_v7  ;;  %v192_v62 = vadd.s32 336, %v2392_v1  ;;  %v193_v63 = vadd.s32 344, %v2392_v1  ;;  %v17_v21 = vld [vmem:[%s3475_s0] sm:$0xff] }
  0x1b   :  { %2186 = vmatprep.subr.msk.bf16.mxu1 %vm1955_vm13, %v2370_v11  ;;  %vm924_vm14 = vmand %vm411_vm8, %vm668_vm9  ;;  %vm430_vm9 = vcmp.ge.s32.totalorder %v171_v22, %v2396_v5  ;;  %vm461_vm13 = vcmp.ge.s32.totalorder %v202_v23, %v2396_v5  ;;  %1596 = vmatprep.mubr.bf16.mxu0 %v134_v52  ;;  %v178_v0 = vadd.s32 224, %v2392_v1  ;;  %v179_v2 = vadd.s32 232, %v2392_v1 }
  0x1c   :  { %vm925_vm1 = vmand %vm412_vm11, %vm669_vm12  ;;  %1636 = vmatprep.mubr.bf16.mxu1 %v136_v53  ;;  %v210_v3 = vadd.s32 480, %v2392_v1  ;;  %v211_v4 = vadd.s32 488, %v2392_v1  ;;  %v162_v6 = vadd.s32 96, %v2392_v1  ;;  %v163_v8 = vadd.s32 104, %v2392_v1 }
  0x1d   :  { %vm1907_vm4 = vmpackc.low %vm925_vm1, %vm924_vm14  ;;  %vm718_vm14 = vcmp.lt.s32.totalorder %v202_v23, %v2401_v7  ;;  %vm719_vm1 = vcmp.lt.s32.totalorder %v203_v24, %v2401_v7  ;;  %v194_v9 = vadd.s32 352, %v2392_v1  ;;  %v195_v10 = vadd.s32 360, %v2392_v1 }
  0x1e   :  { %2165 = vmatpush3.bf16.msk.msra.mxu0 %vm1907_vm4, %v2370_v11  ;;  %vm956_vm5 = vmand %vm443_vm15, %vm700_vm0  ;;  %vm462_vm0 = vcmp.ge.s32.totalorder %v203_v24, %v2396_v5  ;;  %vm413_vm4 = vcmp.ge.s32.totalorder %v154_v25, %v2396_v5  ;;  %v180_v12 = vadd.s32 240, %v2392_v1  ;;  %v181_v13 = vadd.s32 248, %v2392_v1 }
  0x1f   :  { %vm957_vm8 = vmand %vm444_vm2, %vm701_vm3  ;;  %v212_v14 = vadd.s32 496, %v2392_v1  ;;  %v39_v15 = vsub.s32 0, %v2392_v1  ;;  %v213_v16 = vadd.s32 504, %v2392_v1  ;;  %v164_v17 = vadd.s32 112, %v2392_v1 }
  0x20   :  { %vm1939_vm11 = vmpackc.low %vm957_vm8, %vm956_vm5  ;;  %vm670_vm5 = vcmp.lt.s32.totalorder %v154_v25, %v2401_v7  ;;  %vm671_vm8 = vcmp.lt.s32.totalorder %v155_v26, %v2401_v7  ;;  %v47_v18 = vsub.s32 2, %v2392_v1  ;;  %v165_v19 = vadd.s32 120, %v2392_v1 }
  0x21   :  { %2187 = vmatpush3.bf16.msk.msra.mxu1 %vm1939_vm11, %v2370_v11  ;;  %vm942_vm12 = vmand %vm429_vm6, %vm686_vm7  ;;  %vm414_vm7 = vcmp.ge.s32.totalorder %v155_v26, %v2396_v5  ;;  %vm445_vm11 = vcmp.ge.s32.totalorder %v186_v27, %v2396_v5  ;;  %v40_v20 = vrot.slane %v2509_v38, %v39_v15  ;;  %v196_v22 = vadd.s32 368, %v2392_v1  ;;  %v19_v26 = vld [vmem:[%s3475_s0 + $0x10] sm:$0xff] }
  0x22   :  { %vm943_vm15 = vmand %vm430_vm9, %vm687_vm10  ;;  %v197_v23 = vadd.s32 376, %v2392_v1  ;;  %v48_v24 = vrot.slane %v2509_v38, %v47_v18  ;;  %v232_v52 = vadd.s32 656, %v2392_v1  ;;  %v233_v53 = vadd.s32 664, %v2392_v1 }
  0x23   :  { %vm1925_vm2 = vmpackc.low %vm943_vm15, %vm942_vm12  ;;  %vm702_vm12 = vcmp.lt.s32.totalorder %v186_v27, %v2401_v7  ;;  %vm703_vm15 = vcmp.lt.s32.totalorder %v187_v28, %v2401_v7  ;;  %v117_v25 = vmul.f32 %v40_v20, %v17_v21  ;;  %v230_v27 = vadd.s32 640, %v2392_v1 }
  0x24   :  { %2166 = vmatprep.subr.msk.bf16.mxu0 %vm1925_vm2, %v2370_v11  ;;  %vm974_vm3 = vmand %vm461_vm13, %vm718_vm14  ;;  %vm446_vm14 = vcmp.ge.s32.totalorder %v187_v28, %v2396_v5  ;;  %vm431_vm2 = vcmp.ge.s32.totalorder %v172_v29, %v2396_v5  ;;  %v231_v28 = vadd.s32 648, %v2392_v1  ;;  %v270_v20 = vadd.s32 960, %v2392_v1 }
  0x25   :  { %vm975_vm6 = vmand %vm462_vm0, %vm719_vm1  ;;  %v271_v21 = vadd.s32 968, %v2392_v1 }
  0x26   :  { %vm1957_vm9 = vmpackc.low %vm975_vm6, %vm974_vm3  ;;  %vm688_vm3 = vcmp.lt.s32.totalorder %v172_v29, %v2401_v7  ;;  %vm689_vm6 = vcmp.lt.s32.totalorder %v173_v30, %v2401_v7  ;;  %v119_v29 = vmul.f32 %v48_v24, %v19_v26  ;;  %v254_v24 = vadd.s32 832, %v2392_v1 }
  0x27   :  { %2188 = vmatprep.subr.msk.bf16.mxu1 %vm1957_vm9, %v2370_v11  ;;  %vm926_vm10 = vmand %vm413_vm4, %vm670_vm5  ;;  %vm432_vm5 = vcmp.ge.s32.totalorder %v173_v30, %v2396_v5  ;;  %vm463_vm9 = vcmp.ge.s32.totalorder %v204_v31, %v2396_v5  ;;  %v262_v30 = vadd.s32 896, %v2392_v1  ;;  %v240_v26 = vadd.s32 720, %v2392_v1 }
  0x28   :  { %vm927_vm13 = vmand %vm414_vm7, %vm671_vm8 }
  0x29   :  { %vm1909_vm0 = vmpackc.low %vm927_vm13, %vm926_vm10  ;;  %vm720_vm10 = vcmp.lt.s32.totalorder %v204_v31, %v2401_v7  ;;  %vm721_vm13 = vcmp.lt.s32.totalorder %v205_v32, %v2401_v7  ;;  %v133_v31 = vpack.c.bf16 %v117_v25, %v117_v25  ;;  %v255_v25 = vadd.s32 840, %v2392_v1 }
  0x2a   :  { %2167 = vmatpush3.bf16.msk.msra.mxu0 %vm1909_vm0, %v2370_v11  ;;  %vm958_vm1 = vmand %vm445_vm11, %vm702_vm12  ;;  %vm464_vm12 = vcmp.ge.s32.totalorder %v205_v32, %v2396_v5  ;;  %vm415_vm0 = vcmp.ge.s32.totalorder %v156_v33, %v2396_v5  ;;  %v256_v32 = vadd.s32 848, %v2392_v1 }
  0x2b   :  { %vm959_vm4 = vmand %vm446_vm14, %vm703_vm15 }
  0x2c   :  { %vm1941_vm7 = vmpackc.low %vm959_vm4, %vm958_vm1  ;;  %vm672_vm1 = vcmp.lt.s32.totalorder %v156_v33, %v2401_v7  ;;  %vm673_vm4 = vcmp.lt.s32.totalorder %v157_v34, %v2401_v7  ;;  %v263_v33 = vadd.s32 904, %v2392_v1 }
  0x2d   :  { %2189 = vmatpush3.bf16.msk.msra.mxu1 %vm1941_vm7, %v2370_v11  ;;  %vm944_vm8 = vmand %vm431_vm2, %vm688_vm3  ;;  %vm416_vm3 = vcmp.ge.s32.totalorder %v157_v34, %v2396_v5  ;;  %vm447_vm7 = vcmp.ge.s32.totalorder %v188_v35, %v2396_v5  ;;  %v59_v34 = vsub.s32 5, %v2392_v1 }
  0x2e   :  { %vm945_vm11 = vmand %vm432_vm5, %vm689_vm6 }
  0x2f   :  { %vm1927_vm14 = vmpackc.low %vm945_vm11, %vm944_vm8  ;;  %vm704_vm8 = vcmp.lt.s32.totalorder %v188_v35, %v2401_v7  ;;  %vm705_vm11 = vcmp.lt.s32.totalorder %v189_v36, %v2401_v7  ;;  %v67_v35 = vsub.s32 7, %v2392_v1  ;;  %v60_v44 = vrot.slane %v2509_v38, %v59_v34 }
  0x30   :  { %2168 = vmatprep.subr.msk.bf16.mxu0 %vm1927_vm14, %v2370_v11  ;;  %vm976_vm15 = vmand %vm463_vm9, %vm720_vm10  ;;  %vm448_vm10 = vcmp.ge.s32.totalorder %v189_v36, %v2396_v5  ;;  %vm433_vm14 = vcmp.ge.s32.totalorder %v174_v37, %v2396_v5  ;;  %v135_v36 = vpack.c.bf16 %v119_v29, %v119_v29  ;;  %v273_v29 = vadd.s32 984, %v2392_v1 }
  0x31   :  { %vm977_vm2 = vmand %vm464_vm12, %vm721_vm13  ;;  %v68_v45 = vrot.slane %v2509_v38, %v67_v35 }
  0x32   :  { %vm1959_vm5 = vmpackc.low %vm977_vm2, %vm976_vm15  ;;  %vm690_vm15 = vcmp.lt.s32.totalorder %v174_v37, %v2401_v7  ;;  %vm691_vm2 = vcmp.lt.s32.totalorder %v175_v39, %v2401_v7  ;;  %v214_v37 = vadd.s32 512, %v2392_v1 }
  0x33   :  { %2190 = vmatprep.subr.msk.bf16.mxu1 %vm1959_vm5, %v2370_v11  ;;  %vm928_vm6 = vmand %vm415_vm0, %vm672_vm1  ;;  %vm434_vm1 = vcmp.ge.s32.totalorder %v175_v39, %v2396_v5  ;;  %vm465_vm5 = vcmp.ge.s32.totalorder %v206_v43, %v2396_v5  ;;  %v22_v39 = vld [vmem:[%s3475_s0 + $0x28] sm:$0xff]  ;;  %v124_v48 = vmul.f32 %v68_v45, %v24_v41  ;;  %v275_v41 = vadd.s32 1000, %v2392_v1 }
  0x34   :  { %vm929_vm9 = vmand %vm416_vm3, %vm673_vm4  ;;  %v122_v47 = vmul.f32 %v60_v44, %v22_v39  ;;  %v274_v39 = vadd.s32 992, %v2392_v1  ;;  %v227_v44 = vadd.s32 616, %v2392_v1  ;;  %v258_v45 = vadd.s32 864, %v2392_v1 }
  0x35   :  { %vm1911_vm12 = vmpackc.low %vm929_vm9, %vm928_vm6  ;;  %vm722_vm6 = vcmp.lt.s32.totalorder %v206_v43, %v2401_v7  ;;  %vm723_vm9 = vcmp.lt.s32.totalorder %v207_v46, %v2401_v7  ;;  %v215_v43 = vadd.s32 520, %v2392_v1 }
  0x36   :  { %2169 = vmatpush3.bf16.msk.msra.mxu0 %vm1911_vm12, %v2370_v11  ;;  %vm960_vm13 = vmand %vm447_vm7, %vm704_vm8  ;;  %vm466_vm8 = vcmp.ge.s32.totalorder %v207_v46, %v2396_v5  ;;  %vm417_vm12 = vcmp.ge.s32.totalorder %v158_v49, %v2396_v5  ;;  %v246_v46 = vadd.s32 768, %v2392_v1  ;;  %v138_v50 = vpack.c.bf16 %v122_v47, %v122_v47 }
  0x37   :  { %vm961_vm0 = vmand %vm448_vm10, %vm705_vm11  ;;  %v244_v47 = vadd.s32 752, %v2392_v1 }
  0x38   :  { %vm1943_vm3 = vmpackc.low %vm961_vm0, %vm960_vm13  ;;  %vm674_vm13 = vcmp.lt.s32.totalorder %v158_v49, %v2401_v7  ;;  %vm675_vm0 = vcmp.lt.s32.totalorder %v159_v51, %v2401_v7  ;;  %v247_v49 = vadd.s32 776, %v2392_v1 }
  0x39   :  { %2191 = vmatpush3.bf16.msk.msra.mxu1 %vm1943_vm3, %v2370_v11  ;;  %vm946_vm4 = vmand %vm433_vm14, %vm690_vm15  ;;  %vm418_vm15 = vcmp.ge.s32.totalorder %v159_v51, %v2396_v5  ;;  %vm449_vm3 = vcmp.ge.s32.totalorder %v190_v54, %v2396_v5  ;;  %v140_v51 = vpack.c.bf16 %v124_v48, %v124_v48  ;;  %v245_v48 = vadd.s32 760, %v2392_v1 }
  0x3a   :  { %vm947_vm7 = vmand %vm434_vm1, %vm691_vm2 }
  0x3b   :  { %vm1929_vm10 = vmpackc.low %vm947_vm7, %vm946_vm4  ;;  %vm706_vm4 = vcmp.lt.s32.totalorder %v190_v54, %v2401_v7  ;;  %vm707_vm7 = vcmp.lt.s32.totalorder %v191_v55, %v2401_v7  ;;  %v264_v54 = vadd.s32 912, %v2392_v1 }
  0x3c   :  { %2170 = vmatprep.subr.msk.bf16.mxu0 %vm1929_vm10, %v2370_v11  ;;  %vm978_vm11 = vmand %vm465_vm5, %vm722_vm6  ;;  %vm450_vm6 = vcmp.ge.s32.totalorder %v191_v55, %v2396_v5  ;;  %vm435_vm10 = vcmp.ge.s32.totalorder %v176_v56, %v2396_v5  ;;  %v265_v55 = vadd.s32 920, %v2392_v1 }
  0x3d   :  { %vm979_vm14 = vmand %vm466_vm8, %vm723_vm9 }
  0x3e   :  { %vm1961_vm1 = vmpackc.low %vm979_vm14, %vm978_vm11  ;;  %vm692_vm11 = vcmp.lt.s32.totalorder %v176_v56, %v2401_v7  ;;  %vm693_vm14 = vcmp.lt.s32.totalorder %v177_v57, %v2401_v7  ;;  %v216_v56 = vadd.s32 528, %v2392_v1 }
  0x3f   :  { %2192 = vmatprep.subr.msk.bf16.mxu1 %vm1961_vm1, %v2370_v11  ;;  %vm930_vm2 = vmand %vm417_vm12, %vm674_vm13  ;;  %vm436_vm13 = vcmp.ge.s32.totalorder %v177_v57, %v2396_v5  ;;  %vm467_vm1 = vcmp.ge.s32.totalorder %v208_v58, %v2396_v5  ;;  %v217_v57 = vadd.s32 536, %v2392_v1 }
  0x40   :  { %vm931_vm5 = vmand %vm418_vm15, %vm675_vm0 }
  0x41   :  { %vm1913_vm8 = vmpackc.low %vm931_vm5, %vm930_vm2  ;;  %vm724_vm2 = vcmp.lt.s32.totalorder %v208_v58, %v2401_v7  ;;  %vm725_vm5 = vcmp.lt.s32.totalorder %v209_v59, %v2401_v7  ;;  %v248_v58 = vadd.s32 784, %v2392_v1 }
  0x42   :  { %2171 = vmatpush3.bf16.msk.msra.mxu0 %vm1913_vm8, %v2370_v11  ;;  %vm962_vm9 = vmand %vm449_vm3, %vm706_vm4  ;;  %vm468_vm4 = vcmp.ge.s32.totalorder %v209_v59, %v2396_v5  ;;  %vm419_vm8 = vcmp.ge.s32.totalorder %v160_v60, %v2396_v5  ;;  %v249_v59 = vadd.s32 792, %v2392_v1 }
  0x43   :  { %vm963_vm12 = vmand %vm450_vm6, %vm707_vm7 }
  0x44   :  { %vm1945_vm15 = vmpackc.low %vm963_vm12, %vm962_vm9  ;;  %vm676_vm9 = vcmp.lt.s32.totalorder %v160_v60, %v2401_v7  ;;  %vm677_vm12 = vcmp.lt.s32.totalorder %v161_v61, %v2401_v7  ;;  %v234_v60 = vadd.s32 672, %v2392_v1 }
  0x45   :  { %2193 = vmatpush3.bf16.msk.msra.mxu1 %vm1945_vm15, %v2370_v11  ;;  %vm948_vm0 = vmand %vm435_vm10, %vm692_vm11  ;;  %vm420_vm11 = vcmp.ge.s32.totalorder %v161_v61, %v2396_v5  ;;  %vm451_vm15 = vcmp.ge.s32.totalorder %v192_v62, %v2396_v5  ;;  %v235_v61 = vadd.s32 680, %v2392_v1 }
  0x46   :  { %vm949_vm3 = vmand %vm436_vm13, %vm693_vm14 }
  0x47   :  { %vm1931_vm6 = vmpackc.low %vm949_vm3, %vm948_vm0  ;;  %vm708_vm0 = vcmp.lt.s32.totalorder %v192_v62, %v2401_v7  ;;  %vm709_vm3 = vcmp.lt.s32.totalorder %v193_v63, %v2401_v7  ;;  %v266_v62 = vadd.s32 928, %v2392_v1 }
  0x48   :  { %2172 = vmatprep.subr.msk.bf16.mxu0 %vm1931_vm6, %v2370_v11  ;;  %vm980_vm7 = vmand %vm467_vm1, %vm724_vm2  ;;  %vm452_vm2 = vcmp.ge.s32.totalorder %v193_v63, %v2396_v5  ;;  %vm437_vm6 = vcmp.ge.s32.totalorder %v178_v0, %v2396_v5  ;;  %v267_v63 = vadd.s32 936, %v2392_v1 }
  0x49   :  { %vm981_vm10 = vmand %vm468_vm4, %vm725_vm5 }
  0x4a   :  { %vm1963_vm13 = vmpackc.low %vm981_vm10, %vm980_vm7  ;;  %vm694_vm7 = vcmp.lt.s32.totalorder %v178_v0, %v2401_v7  ;;  %vm695_vm10 = vcmp.lt.s32.totalorder %v179_v2, %v2401_v7  ;;  %v218_v0 = vadd.s32 544, %v2392_v1 }
  0x4b   :  { %2194 = vmatprep.subr.msk.bf16.mxu1 %vm1963_vm13, %v2370_v11  ;;  %vm932_vm14 = vmand %vm419_vm8, %vm676_vm9  ;;  %vm438_vm9 = vcmp.ge.s32.totalorder %v179_v2, %v2396_v5  ;;  %vm469_vm13 = vcmp.ge.s32.totalorder %v210_v3, %v2396_v5  ;;  %v219_v2 = vadd.s32 552, %v2392_v1 }
  0x4c   :  { %vm933_vm1 = vmand %vm420_vm11, %vm677_vm12 }
  0x4d   :  { %vm1915_vm4 = vmpackc.low %vm933_vm1, %vm932_vm14  ;;  %vm726_vm14 = vcmp.lt.s32.totalorder %v210_v3, %v2401_v7  ;;  %vm727_vm1 = vcmp.lt.s32.totalorder %v211_v4, %v2401_v7  ;;  %v250_v3 = vadd.s32 800, %v2392_v1 }
  0x4e   :  { %2173 = vmatpush3.bf16.msk.msra.mxu0 %vm1915_vm4, %v2370_v11  ;;  %vm964_vm5 = vmand %vm451_vm15, %vm708_vm0  ;;  %vm470_vm0 = vcmp.ge.s32.totalorder %v211_v4, %v2396_v5  ;;  %vm421_vm4 = vcmp.ge.s32.totalorder %v162_v6, %v2396_v5  ;;  %v251_v4 = vadd.s32 808, %v2392_v1 }
  0x4f   :  { %vm965_vm8 = vmand %vm452_vm2, %vm709_vm3 }
  0x50   :  { %vm1947_vm11 = vmpackc.low %vm965_vm8, %vm964_vm5  ;;  %vm678_vm5 = vcmp.lt.s32.totalorder %v162_v6, %v2401_v7  ;;  %vm679_vm8 = vcmp.lt.s32.totalorder %v163_v8, %v2401_v7  ;;  %v236_v6 = vadd.s32 688, %v2392_v1 }
  0x51   :  { %2195 = vmatpush3.bf16.msk.msra.mxu1 %vm1947_vm11, %v2370_v11  ;;  %vm950_vm12 = vmand %vm437_vm6, %vm694_vm7  ;;  %vm422_vm7 = vcmp.ge.s32.totalorder %v163_v8, %v2396_v5  ;;  %vm453_vm11 = vcmp.ge.s32.totalorder %v194_v9, %v2396_v5  ;;  %v237_v8 = vadd.s32 696, %v2392_v1 }
  0x52   :  { %vm951_vm15 = vmand %vm438_vm9, %vm695_vm10 }
  0x53   :  { %vm1933_vm2 = vmpackc.low %vm951_vm15, %vm950_vm12  ;;  %vm710_vm12 = vcmp.lt.s32.totalorder %v194_v9, %v2401_v7  ;;  %vm711_vm15 = vcmp.lt.s32.totalorder %v195_v10, %v2401_v7  ;;  %v268_v9 = vadd.s32 944, %v2392_v1 }
  0x54   :  { %2174 = vmatprep.subr.msk.bf16.mxu0 %vm1933_vm2, %v2370_v11  ;;  %vm982_vm3 = vmand %vm469_vm13, %vm726_vm14  ;;  %vm454_vm14 = vcmp.ge.s32.totalorder %v195_v10, %v2396_v5  ;;  %vm439_vm2 = vcmp.ge.s32.totalorder %v180_v12, %v2396_v5  ;;  %v269_v10 = vadd.s32 952, %v2392_v1 }
  0x55   :  { %vm983_vm6 = vmand %vm470_vm0, %vm727_vm1 }
  0x56   :  { %vm1965_vm9 = vmpackc.low %vm983_vm6, %vm982_vm3  ;;  %vm696_vm3 = vcmp.lt.s32.totalorder %v180_v12, %v2401_v7  ;;  %vm697_vm6 = vcmp.lt.s32.totalorder %v181_v13, %v2401_v7  ;;  %v220_v12 = vadd.s32 560, %v2392_v1 }
  0x57   :  { %2196 = vmatprep.subr.msk.bf16.mxu1 %vm1965_vm9, %v2370_v11  ;;  %vm934_vm10 = vmand %vm421_vm4, %vm678_vm5  ;;  %vm440_vm5 = vcmp.ge.s32.totalorder %v181_v13, %v2396_v5  ;;  %vm471_vm9 = vcmp.ge.s32.totalorder %v212_v14, %v2396_v5  ;;  %v221_v13 = vadd.s32 568, %v2392_v1 }
  0x58   :  { %vm935_vm13 = vmand %vm422_vm7, %vm679_vm8 }
  0x59   :  { %vm1917_vm0 = vmpackc.low %vm935_vm13, %vm934_vm10  ;;  %vm728_vm10 = vcmp.lt.s32.totalorder %v212_v14, %v2401_v7  ;;  %vm729_vm13 = vcmp.lt.s32.totalorder %v213_v16, %v2401_v7  ;;  %v252_v14 = vadd.s32 816, %v2392_v1 }
  0x5a   :  { %2175 = vmatpush3.bf16.msk.msra.mxu0 %vm1917_vm0, %v2370_v11  ;;  %vm966_vm1 = vmand %vm453_vm11, %vm710_vm12  ;;  %vm472_vm12 = vcmp.ge.s32.totalorder %v213_v16, %v2396_v5  ;;  %vm423_vm0 = vcmp.ge.s32.totalorder %v164_v17, %v2396_v5  ;;  %v253_v16 = vadd.s32 824, %v2392_v1 }
  0x5b   :  { %vm967_vm4 = vmand %vm454_vm14, %vm711_vm15 }
  0x5c   :  { %vm1949_vm7 = vmpackc.low %vm967_vm4, %vm966_vm1  ;;  %vm680_vm1 = vcmp.lt.s32.totalorder %v164_v17, %v2401_v7  ;;  %vm681_vm4 = vcmp.lt.s32.totalorder %v165_v19, %v2401_v7  ;;  %v238_v17 = vadd.s32 704, %v2392_v1 }
  0x5d   :  { %2197 = vmatpush3.bf16.msk.msra.mxu1 %vm1949_vm7, %v2370_v11  ;;  %vm952_vm8 = vmand %vm439_vm2, %vm696_vm3  ;;  %vm424_vm3 = vcmp.ge.s32.totalorder %v165_v19, %v2396_v5  ;;  %vm455_vm7 = vcmp.ge.s32.totalorder %v196_v22, %v2396_v5  ;;  %v239_v19 = vadd.s32 712, %v2392_v1 }
  0x5e   :  { %vm953_vm11 = vmand %vm440_vm5, %vm697_vm6 }
  0x5f   :  { %vm1935_vm14 = vmpackc.low %vm953_vm11, %vm952_vm8  ;;  %vm712_vm8 = vcmp.lt.s32.totalorder %v196_v22, %v2401_v7  ;;  %vm713_vm11 = vcmp.lt.s32.totalorder %v197_v23, %v2401_v7  ;;  %v222_v22 = vadd.s32 576, %v2392_v1 }
  0x60   :  { %2176 = vmatprep.subr.msk.bf16.mxu0 %vm1935_vm14, %v2370_v11  ;;  %vm984_vm15 = vmand %vm471_vm9, %vm728_vm10  ;;  %vm456_vm10 = vcmp.ge.s32.totalorder %v197_v23, %v2396_v5  ;;  %vm489_vm14 = vcmp.ge.s32.totalorder %v230_v27, %v2396_v5  ;;  %v223_v23 = vadd.s32 584, %v2392_v1 }
  0x61   :  { %vm985_vm2 = vmand %vm472_vm12, %vm729_vm13 }
  0x62   :  { %vm1967_vm5 = vmpackc.low %vm985_vm2, %vm984_vm15  ;;  %vm746_vm15 = vcmp.lt.s32.totalorder %v230_v27, %v2401_v7  ;;  %vm747_vm2 = vcmp.lt.s32.totalorder %v231_v28, %v2401_v7  ;;  %v241_v27 = vadd.s32 728, %v2392_v1 }
  0x63   :  { %2198 = vmatprep.subr.msk.bf16.mxu1 %vm1967_vm5, %v2370_v11  ;;  %vm936_vm6 = vmand %vm423_vm0, %vm680_vm1  ;;  %vm490_vm1 = vcmp.ge.s32.totalorder %v231_v28, %v2396_v5  ;;  %v272_v28 = vadd.s32 976, %v2392_v1 }
  0x64   :  { %vm937_vm9 = vmand %vm424_vm3, %vm681_vm4  ;;  %vm521_vm4 = vcmp.ge.s32.totalorder %v262_v30, %v2396_v5 }
  0x65   :  { %vm1919_vm12 = vmpackc.low %vm937_vm9, %vm936_vm6  ;;  %vm778_vm6 = vcmp.lt.s32.totalorder %v262_v30, %v2401_v7  ;;  %vm779_vm9 = vcmp.lt.s32.totalorder %v263_v33, %v2401_v7  ;;  %v224_v30 = vadd.s32 592, %v2392_v1 }
  0x66   :  { %2177 = vmatpush3.bf16.msk.msra.mxu0 %vm1919_vm12, %v2370_v11  ;;  %vm2659_vm13 = vmand %vm455_vm7, %vm712_vm8  ;;  %vm522_vm8 = vcmp.ge.s32.totalorder %v263_v33, %v2396_v5  ;;  %vm473_vm12 = vcmp.ge.s32.totalorder %v214_v37, %v2396_v5  ;;  %v257_v33 = vadd.s32 856, %v2392_v1 }
  0x67   :  { %vm969_vm0 = vmand %vm456_vm10, %vm713_vm11 }
  0x68   :  { %vm1951_vm3 = vmpackc.low %vm969_vm0, %vm2659_vm13  ;;  %vm730_vm13 = vcmp.lt.s32.totalorder %v214_v37, %v2401_v7  ;;  %vm731_vm0 = vcmp.lt.s32.totalorder %v215_v43, %v2401_v7  ;;  %v243_v37 = vadd.s32 744, %v2392_v1 }
  0x69   :  { %2199 = vmatpush3.bf16.msk.msra.mxu1 %vm1951_vm3, %v2370_v11  ;;  %1597 = vmatmul.mubr.bf16.vlgmr.msra.gmra.mrb[0].mxu0 %v133_v31  ;;  %vm1002_vm5 = vmand %vm489_vm14, %vm746_vm15  ;;  %vm474_vm15 = vcmp.ge.s32.totalorder %v215_v43, %v2396_v5  ;;  %vm505_vm3 = vcmp.ge.s32.totalorder %v246_v46, %v2396_v5  ;;  %v225_v31 = vadd.s32 600, %v2392_v1  ;;  %v226_v43 = vadd.s32 608, %v2392_v1 }
  0x6a   :  { %vm1003_vm7 = vmand %vm490_vm1, %vm747_vm2  ;;  %1676 = vmatprep.mubr.bf16.mxu0 %v138_v50  ;;  %v55_v50 = vsub.s32 4, %v2392_v1 }
  0x6b   :  { %vm1985_vm10 = vmpackc.low %vm1003_vm7, %vm1002_vm5  ;;  %vm763_vm7 = vcmp.lt.s32.totalorder %v247_v49, %v2401_v7 }
  0x6c   :  { %1637 = vmatmul.mubr.bf16.vlgmr.msra.gmra.mrb[0].mxu1 %v135_v36  ;;  %2206 = vmatprep.subr.msk.bf16.mxu0 %vm1985_vm10, %v2370_v11  ;;  %vm1034_vm11 = vmand %vm521_vm4, %vm778_vm6  ;;  %vm762_vm4 = vcmp.lt.s32.totalorder %v246_v46, %v2401_v7  ;;  %vm506_vm6 = vcmp.ge.s32.totalorder %v247_v49, %v2396_v5  ;;  %vm491_vm10 = vcmp.ge.s32.totalorder %v232_v52, %v2396_v5  ;;  %v242_v36 = vadd.s32 736, %v2392_v1 }
  0x6d   :  { %vm1035_vm14 = vmand %vm522_vm8, %vm779_vm9  ;;  %1716 = vmatprep.mubr.bf16.mxu1 %v140_v51  ;;  %v259_v46 = vadd.s32 872, %v2392_v1  ;;  %v276_v49 = vadd.s32 1008, %v2392_v1  ;;  %v277_v51 = vadd.s32 1016, %v2392_v1 }
  0x6e   :  { %vm2017_vm1 = vmpackc.low %vm1035_vm14, %vm1034_vm11  ;;  %vm748_vm11 = vcmp.lt.s32.totalorder %v232_v52, %v2401_v7  ;;  %vm749_vm14 = vcmp.lt.s32.totalorder %v233_v53, %v2401_v7  ;;  %v2894_v52 = vld [vmem:[%s3476_s1 + $0x8] sm:$0xff] }
  0x6f   :  { %2228 = vmatprep.subr.msk.bf16.mxu1 %vm2017_vm1, %v2370_v11  ;;  %vm986_vm2 = vmand %vm473_vm12, %vm730_vm13  ;;  %vm492_vm13 = vcmp.ge.s32.totalorder %v233_v53, %v2396_v5  ;;  %vm523_vm1 = vcmp.ge.s32.totalorder %v264_v54, %v2396_v5  ;;  %v228_v53 = vadd.s32 624, %v2392_v1 }
  0x70   :  { %vm987_vm5 = vmand %vm474_vm15, %vm731_vm0 }
  0x71   :  { %vm1969_vm8 = vmpackc.low %vm987_vm5, %vm986_vm2  ;;  %vm780_vm2 = vcmp.lt.s32.totalorder %v264_v54, %v2401_v7  ;;  %vm781_vm5 = vcmp.lt.s32.totalorder %v265_v55, %v2401_v7  ;;  %v63_v54 = vsub.s32 6, %v2392_v1 }
  0x72   :  { %2207 = vmatpush3.bf16.msk.msra.mxu0 %vm1969_vm8, %v2370_v11  ;;  %vm1018_vm9 = vmand %vm505_vm3, %vm762_vm4  ;;  %vm524_vm4 = vcmp.ge.s32.totalorder %v265_v55, %v2396_v5  ;;  %vm475_vm8 = vcmp.ge.s32.totalorder %v216_v56, %v2396_v5  ;;  %v229_v55 = vadd.s32 632, %v2392_v1 }
  0x73   :  { %vm1019_vm12 = vmand %vm506_vm6, %vm763_vm7 }
  0x74   :  { %vm2001_vm15 = vmpackc.low %vm1019_vm12, %vm1018_vm9  ;;  %vm732_vm9 = vcmp.lt.s32.totalorder %v216_v56, %v2401_v7  ;;  %vm733_vm12 = vcmp.lt.s32.totalorder %v217_v57, %v2401_v7  ;;  %v56_v56 = vrot.slane %v2509_v38, %v55_v50  ;;  %v26_v38 = vld [vmem:[%s3475_s0 + $0x48] sm:$0xff] }
  0x75   :  { %2229 = vmatpush3.bf16.msk.msra.mxu1 %vm2001_vm15, %v2370_v11  ;;  %vm1004_vm0 = vmand %vm491_vm10, %vm748_vm11  ;;  %vm476_vm11 = vcmp.ge.s32.totalorder %v217_v57, %v2396_v5  ;;  %vm507_vm15 = vcmp.ge.s32.totalorder %v248_v58, %v2396_v5  ;;  %v21_v57 = vld [vmem:[%s3475_s0 + $0x20] sm:$0xff] }
  0x76   :  { %vm1005_vm3 = vmand %vm492_vm13, %vm749_vm14 }
  0x77   :  { %vm1987_vm6 = vmpackc.low %vm1005_vm3, %vm1004_vm0  ;;  %vm764_vm0 = vcmp.lt.s32.totalorder %v248_v58, %v2401_v7  ;;  %vm765_vm3 = vcmp.lt.s32.totalorder %v249_v59, %v2401_v7  ;;  %v76_v58 = vrot.slane %v2894_v52, %v43_v40  ;;  %v2344_v40 = vld [vmem:[%s3476_s1] sm:$0xff] }
  0x78   :  { %2208 = vmatprep.subr.msk.bf16.mxu0 %vm1987_vm6, %v2370_v11  ;;  %vm1036_vm7 = vmand %vm523_vm1, %vm780_vm2  ;;  %vm508_vm2 = vcmp.ge.s32.totalorder %v249_v59, %v2396_v5  ;;  %vm493_vm6 = vcmp.ge.s32.totalorder %v234_v60, %v2396_v5  ;;  %v260_v59 = vadd.s32 880, %v2392_v1 }
  0x79   :  { %vm1037_vm10 = vmand %vm524_vm4, %vm781_vm5 }
  0x7a   :  { %vm2019_vm13 = vmpackc.low %vm1037_vm10, %vm1036_vm7  ;;  %vm750_vm7 = vcmp.lt.s32.totalorder %v234_v60, %v2401_v7  ;;  %vm751_vm10 = vcmp.lt.s32.totalorder %v235_v61, %v2401_v7  ;;  %v318_v60 = vadd.s32 1344, %v2392_v1 }
  0x7b   :  { %2230 = vmatprep.subr.msk.bf16.mxu1 %vm2019_vm13, %v2370_v11  ;;  %vm988_vm14 = vmand %vm475_vm8, %vm732_vm9  ;;  %vm494_vm9 = vcmp.ge.s32.totalorder %v235_v61, %v2396_v5  ;;  %vm525_vm13 = vcmp.ge.s32.totalorder %v266_v62, %v2396_v5  ;;  %v261_v61 = vadd.s32 888, %v2392_v1 }
  0x7c   :  { %vm989_vm1 = vmand %vm476_vm11, %vm733_vm12 }
  0x7d   :  { %vm1971_vm4 = vmpackc.low %vm989_vm1, %vm988_vm14  ;;  %vm782_vm14 = vcmp.lt.s32.totalorder %v266_v62, %v2401_v7  ;;  %vm783_vm1 = vcmp.lt.s32.totalorder %v267_v63, %v2401_v7  ;;  %v64_v62 = vrot.slane %v2344_v40, %v63_v54  ;;  %v304_v40 = vadd.s32 1232, %v2392_v1 }
  0x7e   :  { %2209 = vmatpush3.bf16.msk.msra.mxu0 %vm1971_vm4, %v2370_v11  ;;  %vm1020_vm5 = vmand %vm507_vm15, %vm764_vm0  ;;  %vm526_vm0 = vcmp.ge.s32.totalorder %v267_v63, %v2396_v5  ;;  %vm477_vm4 = vcmp.ge.s32.totalorder %v218_v0, %v2396_v5  ;;  %v121_v63 = vmul.f32 %v56_v56, %v21_v57  ;;  %v303_v56 = vadd.s32 1224, %v2392_v1 }
  0x7f   :  { %vm1021_vm8 = vmand %vm508_vm2, %vm765_vm3  ;;  %v334_v57 = vadd.s32 1472, %v2392_v1 }
  0x80   :  { %vm2003_vm11 = vmpackc.low %vm1021_vm8, %vm1020_vm5  ;;  %vm734_vm5 = vcmp.lt.s32.totalorder %v218_v0, %v2401_v7  ;;  %vm735_vm8 = vcmp.lt.s32.totalorder %v219_v2, %v2401_v7  ;;  %v23_v0 = vld [vmem:[%s3475_s0 + $0x30] sm:$0xff] }
  0x81   :  { %2231 = vmatpush3.bf16.msk.msra.mxu1 %vm2003_vm11, %v2370_v11  ;;  %vm1006_vm12 = vmand %vm493_vm6, %vm750_vm7  ;;  %vm478_vm7 = vcmp.ge.s32.totalorder %v219_v2, %v2396_v5  ;;  %vm509_vm11 = vcmp.ge.s32.totalorder %v250_v3, %v2396_v5  ;;  %v84_v2 = vrot.slane %v2894_v52, %v51_v42  ;;  %v295_v42 = vadd.s32 1160, %v2392_v1 }
  0x82   :  { %vm1007_vm15 = vmand %vm494_vm9, %vm751_vm10 }
  0x83   :  { %vm1989_vm2 = vmpackc.low %vm1007_vm15, %vm1006_vm12  ;;  %vm766_vm12 = vcmp.lt.s32.totalorder %v250_v3, %v2401_v7  ;;  %vm767_vm15 = vcmp.lt.s32.totalorder %v251_v4, %v2401_v7  ;;  %v294_v3 = vadd.s32 1152, %v2392_v1 }
  0x84   :  { %2210 = vmatprep.subr.msk.bf16.mxu0 %vm1989_vm2, %v2370_v11  ;;  %vm1038_vm3 = vmand %vm525_vm13, %vm782_vm14  ;;  %vm510_vm14 = vcmp.ge.s32.totalorder %v251_v4, %v2396_v5  ;;  %vm495_vm2 = vcmp.ge.s32.totalorder %v236_v6, %v2396_v5  ;;  %v126_v4 = vmul.f32 %v76_v58, %v26_v38  ;;  %v335_v58 = vadd.s32 1480, %v2392_v1 }
  0x85   :  { %vm1039_vm6 = vmand %vm526_vm0, %vm783_vm1  ;;  %v287_v38 = vadd.s32 1096, %v2392_v1 }
  0x86   :  { %vm2021_vm9 = vmpackc.low %vm1039_vm6, %vm1038_vm3  ;;  %vm752_vm3 = vcmp.lt.s32.totalorder %v236_v6, %v2401_v7  ;;  %vm753_vm6 = vcmp.lt.s32.totalorder %v237_v8, %v2401_v7  ;;  %v28_v6 = vld [vmem:[%s3475_s0 + $0x58] sm:$0xff] }
  0x87   :  { %2232 = vmatprep.subr.msk.bf16.mxu1 %vm2021_vm9, %v2370_v11  ;;  %vm990_vm10 = vmand %vm477_vm4, %vm734_vm5  ;;  %vm496_vm5 = vcmp.ge.s32.totalorder %v237_v8, %v2396_v5  ;;  %vm527_vm9 = vcmp.ge.s32.totalorder %v268_v9, %v2396_v5  ;;  %v123_v8 = vmul.f32 %v64_v62, %v23_v0  ;;  %v305_v62 = vadd.s32 1240, %v2392_v1 }
  0x88   :  { %vm991_vm13 = vmand %vm478_vm7, %vm735_vm8  ;;  %v337_v0 = vadd.s32 1496, %v2392_v1 }
  0x89   :  { %vm1973_vm0 = vmpackc.low %vm991_vm13, %vm990_vm10  ;;  %vm784_vm10 = vcmp.lt.s32.totalorder %v268_v9, %v2401_v7  ;;  %vm785_vm13 = vcmp.lt.s32.totalorder %v269_v10, %v2401_v7  ;;  %v137_v9 = vpack.c.bf16 %v121_v63, %v121_v63  ;;  %v336_v63 = vadd.s32 1488, %v2392_v1 }
  0x8a   :  { %2211 = vmatpush3.bf16.msk.msra.mxu0 %vm1973_vm0, %v2370_v11  ;;  %vm1022_vm1 = vmand %vm509_vm11, %vm766_vm12  ;;  %vm528_vm12 = vcmp.ge.s32.totalorder %v269_v10, %v2396_v5  ;;  %vm479_vm0 = vcmp.ge.s32.totalorder %v220_v12, %v2396_v5  ;;  %v326_v10 = vadd.s32 1408, %v2392_v1 }
  0x8b   :  { %vm1023_vm4 = vmand %vm510_vm14, %vm767_vm15 }
  0x8c   :  { %vm2005_vm7 = vmpackc.low %vm1023_vm4, %vm1022_vm1  ;;  %vm736_vm1 = vcmp.lt.s32.totalorder %v220_v12, %v2401_v7  ;;  %vm737_vm4 = vcmp.lt.s32.totalorder %v221_v13, %v2401_v7  ;;  %v128_v12 = vmul.f32 %v84_v2, %v28_v6  ;;  %v288_v2 = vadd.s32 1104, %v2392_v1 }
  0x8d   :  { %2233 = vmatpush3.bf16.msk.msra.mxu1 %vm2005_vm7, %v2370_v11  ;;  %vm1008_vm8 = vmand %vm495_vm2, %vm752_vm3  ;;  %vm480_vm3 = vcmp.ge.s32.totalorder %v221_v13, %v2396_v5  ;;  %vm511_vm7 = vcmp.ge.s32.totalorder %v252_v14, %v2396_v5  ;;  %v327_v13 = vadd.s32 1416, %v2392_v1  ;;  %v321_v6 = vadd.s32 1368, %v2392_v1 }
  0x8e   :  { %vm1009_vm11 = vmand %vm496_vm5, %vm753_vm6 }
  0x8f   :  { %vm1991_vm14 = vmpackc.low %vm1009_vm11, %vm1008_vm8  ;;  %vm768_vm8 = vcmp.lt.s32.totalorder %v252_v14, %v2401_v7  ;;  %vm769_vm11 = vcmp.lt.s32.totalorder %v253_v16, %v2401_v7  ;;  %v142_v14 = vpack.c.bf16 %v126_v4, %v126_v4  ;;  %v320_v4 = vadd.s32 1360, %v2392_v1 }
  0x90   :  { %2212 = vmatprep.subr.msk.bf16.mxu0 %vm1991_vm14, %v2370_v11  ;;  %vm1040_vm15 = vmand %vm527_vm9, %vm784_vm10  ;;  %vm512_vm10 = vcmp.ge.s32.totalorder %v253_v16, %v2396_v5  ;;  %vm497_vm14 = vcmp.ge.s32.totalorder %v238_v17, %v2396_v5  ;;  %v139_v16 = vpack.c.bf16 %v123_v8, %v123_v8  ;;  %v307_v8 = vadd.s32 1256, %v2392_v1 }
  0x91   :  { %vm1041_vm2 = vmand %vm528_vm12, %vm785_vm13 }
  0x92   :  { %vm2023_vm5 = vmpackc.low %vm1041_vm2, %vm1040_vm15  ;;  %vm754_vm15 = vcmp.lt.s32.totalorder %v238_v17, %v2401_v7  ;;  %vm755_vm2 = vcmp.lt.s32.totalorder %v239_v19, %v2401_v7  ;;  %v278_v17 = vadd.s32 1024, %v2392_v1 }
  0x93   :  { %2234 = vmatprep.subr.msk.bf16.mxu1 %vm2023_vm5, %v2370_v11  ;;  %vm992_vm6 = vmand %vm479_vm0, %vm736_vm1  ;;  %vm498_vm1 = vcmp.ge.s32.totalorder %v239_v19, %v2396_v5  ;;  %vm529_vm5 = vcmp.ge.s32.totalorder %v270_v20, %v2396_v5  ;;  %v279_v19 = vadd.s32 1032, %v2392_v1 }
  0x94   :  { %vm993_vm9 = vmand %vm480_vm3, %vm737_vm4 }
  0x95   :  { %vm1975_vm12 = vmpackc.low %vm993_vm9, %vm992_vm6  ;;  %vm786_vm6 = vcmp.lt.s32.totalorder %v270_v20, %v2401_v7  ;;  %vm787_vm9 = vcmp.lt.s32.totalorder %v271_v21, %v2401_v7  ;;  %v144_v20 = vpack.c.bf16 %v128_v12, %v128_v12  ;;  %v290_v12 = vadd.s32 1120, %v2392_v1 }
  0x96   :  { %2213 = vmatpush3.bf16.msk.msra.mxu0 %vm1975_vm12, %v2370_v11  ;;  %vm1024_vm13 = vmand %vm511_vm7, %vm768_vm8  ;;  %vm530_vm8 = vcmp.ge.s32.totalorder %v271_v21, %v2396_v5  ;;  %vm481_vm12 = vcmp.ge.s32.totalorder %v222_v22, %v2396_v5  ;;  %v310_v21 = vadd.s32 1280, %v2392_v1 }
  0x97   :  { %vm1025_vm0 = vmand %vm512_vm10, %vm769_vm11 }
  0x98   :  { %vm2007_vm3 = vmpackc.low %vm1025_vm0, %vm1024_vm13  ;;  %vm738_vm13 = vcmp.lt.s32.totalorder %v222_v22, %v2401_v7  ;;  %vm739_vm0 = vcmp.lt.s32.totalorder %v223_v23, %v2401_v7  ;;  %v311_v22 = vadd.s32 1288, %v2392_v1 }
  0x99   :  { %2235 = vmatpush3.bf16.msk.msra.mxu1 %vm2007_vm3, %v2370_v11  ;;  %vm1010_vm4 = vmand %vm497_vm14, %vm754_vm15  ;;  %vm482_vm15 = vcmp.ge.s32.totalorder %v223_v23, %v2396_v5  ;;  %vm513_vm3 = vcmp.ge.s32.totalorder %v254_v24, %v2396_v5  ;;  %v296_v23 = vadd.s32 1168, %v2392_v1 }
  0x9a   :  { %vm1011_vm7 = vmand %vm498_vm1, %vm755_vm2 }
  0x9b   :  { %vm1993_vm10 = vmpackc.low %vm1011_vm7, %vm1010_vm4  ;;  %vm770_vm4 = vcmp.lt.s32.totalorder %v254_v24, %v2401_v7  ;;  %vm771_vm7 = vcmp.lt.s32.totalorder %v255_v25, %v2401_v7  ;;  %v297_v24 = vadd.s32 1176, %v2392_v1 }
  0x9c   :  { %2214 = vmatprep.subr.msk.bf16.mxu0 %vm1993_vm10, %v2370_v11  ;;  %vm1042_vm11 = vmand %vm529_vm5, %vm786_vm6  ;;  %vm514_vm6 = vcmp.ge.s32.totalorder %v255_v25, %v2396_v5  ;;  %vm499_vm10 = vcmp.ge.s32.totalorder %v240_v26, %v2396_v5  ;;  %v328_v25 = vadd.s32 1424, %v2392_v1 }
  0x9d   :  { %vm1043_vm14 = vmand %vm530_vm8, %vm787_vm9 }
  0x9e   :  { %vm2025_vm1 = vmpackc.low %vm1043_vm14, %vm1042_vm11  ;;  %vm756_vm11 = vcmp.lt.s32.totalorder %v240_v26, %v2401_v7  ;;  %vm757_vm14 = vcmp.lt.s32.totalorder %v241_v27, %v2401_v7  ;;  %v329_v26 = vadd.s32 1432, %v2392_v1 }
  0x9f   :  { %2236 = vmatprep.subr.msk.bf16.mxu1 %vm2025_vm1, %v2370_v11  ;;  %vm994_vm2 = vmand %vm481_vm12, %vm738_vm13  ;;  %vm500_vm13 = vcmp.ge.s32.totalorder %v241_v27, %v2396_v5  ;;  %vm531_vm1 = vcmp.ge.s32.totalorder %v272_v28, %v2396_v5  ;;  %v280_v27 = vadd.s32 1040, %v2392_v1 }
  0xa0   :  { %vm995_vm5 = vmand %vm482_vm15, %vm739_vm0 }
  0xa1   :  { %vm1977_vm8 = vmpackc.low %vm995_vm5, %vm994_vm2  ;;  %vm788_vm2 = vcmp.lt.s32.totalorder %v272_v28, %v2401_v7  ;;  %vm789_vm5 = vcmp.lt.s32.totalorder %v273_v29, %v2401_v7  ;;  %v281_v28 = vadd.s32 1048, %v2392_v1 }
  0xa2   :  { %2215 = vmatpush3.bf16.msk.msra.mxu0 %vm1977_vm8, %v2370_v11  ;;  %vm1026_vm9 = vmand %vm513_vm3, %vm770_vm4  ;;  %vm532_vm4 = vcmp.ge.s32.totalorder %v273_v29, %v2396_v5  ;;  %vm483_vm8 = vcmp.ge.s32.totalorder %v224_v30, %v2396_v5  ;;  %v312_v29 = vadd.s32 1296, %v2392_v1 }
  0xa3   :  { %vm1027_vm12 = vmand %vm514_vm6, %vm771_vm7 }
  0xa4   :  { %vm2009_vm15 = vmpackc.low %vm1027_vm12, %vm1026_vm9  ;;  %vm740_vm9 = vcmp.lt.s32.totalorder %v224_v30, %v2401_v7  ;;  %vm741_vm12 = vcmp.lt.s32.totalorder %v225_v31, %v2401_v7  ;;  %v313_v30 = vadd.s32 1304, %v2392_v1 }
  0xa5   :  { %2237 = vmatpush3.bf16.msk.msra.mxu1 %vm2009_vm15, %v2370_v11  ;;  %vm1012_vm0 = vmand %vm499_vm10, %vm756_vm11  ;;  %vm484_vm11 = vcmp.ge.s32.totalorder %v225_v31, %v2396_v5  ;;  %vm515_vm15 = vcmp.ge.s32.totalorder %v256_v32, %v2396_v5  ;;  %v298_v31 = vadd.s32 1184, %v2392_v1 }
  0xa6   :  { %vm1013_vm3 = vmand %vm500_vm13, %vm757_vm14 }
  0xa7   :  { %vm1995_vm6 = vmpackc.low %vm1013_vm3, %vm1012_vm0  ;;  %vm772_vm0 = vcmp.lt.s32.totalorder %v256_v32, %v2401_v7  ;;  %vm773_vm3 = vcmp.lt.s32.totalorder %v257_v33, %v2401_v7  ;;  %v299_v32 = vadd.s32 1192, %v2392_v1 }
  0xa8   :  { %2216 = vmatprep.subr.msk.bf16.mxu0 %vm1995_vm6, %v2370_v11  ;;  %vm1044_vm7 = vmand %vm531_vm1, %vm788_vm2  ;;  %vm516_vm2 = vcmp.ge.s32.totalorder %v257_v33, %v2396_v5  ;;  %vm501_vm6 = vcmp.ge.s32.totalorder %v242_v36, %v2396_v5  ;;  %v330_v33 = vadd.s32 1440, %v2392_v1 }
  0xa9   :  { %vm1045_vm10 = vmand %vm532_vm4, %vm789_vm5 }
  0xaa   :  { %vm2027_vm13 = vmpackc.low %vm1045_vm10, %vm1044_vm7  ;;  %vm758_vm7 = vcmp.lt.s32.totalorder %v242_v36, %v2401_v7  ;;  %vm759_vm10 = vcmp.lt.s32.totalorder %v243_v37, %v2401_v7  ;;  %v331_v36 = vadd.s32 1448, %v2392_v1 }
  0xab   :  { %2238 = vmatprep.subr.msk.bf16.mxu1 %vm2027_vm13, %v2370_v11  ;;  %vm996_vm14 = vmand %vm483_vm8, %vm740_vm9  ;;  %vm502_vm9 = vcmp.ge.s32.totalorder %v243_v37, %v2396_v5  ;;  %vm533_vm13 = vcmp.ge.s32.totalorder %v274_v39, %v2396_v5  ;;  %v282_v37 = vadd.s32 1056, %v2392_v1 }
  0xac   :  { %vm997_vm1 = vmand %vm484_vm11, %vm741_vm12 }
  0xad   :  { %vm1979_vm4 = vmpackc.low %vm997_vm1, %vm996_vm14  ;;  %vm790_vm14 = vcmp.lt.s32.totalorder %v274_v39, %v2401_v7  ;;  %vm791_vm1 = vcmp.lt.s32.totalorder %v275_v41, %v2401_v7  ;;  %v283_v39 = vadd.s32 1064, %v2392_v1 }
  0xae   :  { %2217 = vmatpush3.bf16.msk.msra.mxu0 %vm1979_vm4, %v2370_v11  ;;  %vm1028_vm5 = vmand %vm515_vm15, %vm772_vm0  ;;  %vm534_vm0 = vcmp.ge.s32.totalorder %v275_v41, %v2396_v5  ;;  %vm485_vm4 = vcmp.ge.s32.totalorder %v226_v43, %v2396_v5  ;;  %v314_v41 = vadd.s32 1312, %v2392_v1 }
  0xaf   :  { %vm1029_vm8 = vmand %vm516_vm2, %vm773_vm3 }
  0xb0   :  { %vm2011_vm11 = vmpackc.low %vm1029_vm8, %vm1028_vm5  ;;  %vm742_vm5 = vcmp.lt.s32.totalorder %v226_v43, %v2401_v7  ;;  %vm743_vm8 = vcmp.lt.s32.totalorder %v227_v44, %v2401_v7  ;;  %v315_v43 = vadd.s32 1320, %v2392_v1 }
  0xb1   :  { %2239 = vmatpush3.bf16.msk.msra.mxu1 %vm2011_vm11, %v2370_v11  ;;  %vm1014_vm12 = vmand %vm501_vm6, %vm758_vm7  ;;  %vm486_vm7 = vcmp.ge.s32.totalorder %v227_v44, %v2396_v5  ;;  %vm517_vm11 = vcmp.ge.s32.totalorder %v258_v45, %v2396_v5  ;;  %v300_v44 = vadd.s32 1200, %v2392_v1 }
  0xb2   :  { %vm1015_vm15 = vmand %vm502_vm9, %vm759_vm10 }
  0xb3   :  { %vm1997_vm2 = vmpackc.low %vm1015_vm15, %vm1014_vm12  ;;  %vm774_vm12 = vcmp.lt.s32.totalorder %v258_v45, %v2401_v7  ;;  %vm775_vm15 = vcmp.lt.s32.totalorder %v259_v46, %v2401_v7  ;;  %v301_v45 = vadd.s32 1208, %v2392_v1 }
  0xb4   :  { %2218 = vmatprep.subr.msk.bf16.mxu0 %vm1997_vm2, %v2370_v11  ;;  %vm1046_vm3 = vmand %vm533_vm13, %vm790_vm14  ;;  %vm518_vm14 = vcmp.ge.s32.totalorder %v259_v46, %v2396_v5  ;;  %vm503_vm2 = vcmp.ge.s32.totalorder %v244_v47, %v2396_v5  ;;  %v332_v46 = vadd.s32 1456, %v2392_v1 }
  0xb5   :  { %vm1047_vm6 = vmand %vm534_vm0, %vm791_vm1 }
  0xb6   :  { %vm2029_vm9 = vmpackc.low %vm1047_vm6, %vm1046_vm3  ;;  %vm760_vm3 = vcmp.lt.s32.totalorder %v244_v47, %v2401_v7  ;;  %vm761_vm6 = vcmp.lt.s32.totalorder %v245_v48, %v2401_v7  ;;  %v333_v47 = vadd.s32 1464, %v2392_v1 }
  0xb7   :  { %2240 = vmatprep.subr.msk.bf16.mxu1 %vm2029_vm9, %v2370_v11  ;;  %vm998_vm10 = vmand %vm485_vm4, %vm742_vm5  ;;  %vm504_vm5 = vcmp.ge.s32.totalorder %v245_v48, %v2396_v5  ;;  %vm535_vm9 = vcmp.ge.s32.totalorder %v276_v49, %v2396_v5  ;;  %v284_v48 = vadd.s32 1072, %v2392_v1 }
  0xb8   :  { %vm999_vm13 = vmand %vm486_vm7, %vm743_vm8 }
  0xb9   :  { %vm1981_vm0 = vmpackc.low %vm999_vm13, %vm998_vm10  ;;  %vm792_vm10 = vcmp.lt.s32.totalorder %v276_v49, %v2401_v7  ;;  %vm793_vm13 = vcmp.lt.s32.totalorder %v277_v51, %v2401_v7  ;;  %v285_v49 = vadd.s32 1080, %v2392_v1 }
  0xba   :  { %2219 = vmatpush3.bf16.msk.msra.mxu0 %vm1981_vm0, %v2370_v11  ;;  %vm1030_vm1 = vmand %vm517_vm11, %vm774_vm12  ;;  %vm536_vm12 = vcmp.ge.s32.totalorder %v277_v51, %v2396_v5  ;;  %vm487_vm0 = vcmp.ge.s32.totalorder %v228_v53, %v2396_v5  ;;  %v316_v51 = vadd.s32 1328, %v2392_v1 }
  0xbb   :  { %vm1031_vm4 = vmand %vm518_vm14, %vm775_vm15 }
  0xbc   :  { %vm2013_vm7 = vmpackc.low %vm1031_vm4, %vm1030_vm1  ;;  %vm744_vm1 = vcmp.lt.s32.totalorder %v228_v53, %v2401_v7  ;;  %vm745_vm4 = vcmp.lt.s32.totalorder %v229_v55, %v2401_v7  ;;  %v317_v53 = vadd.s32 1336, %v2392_v1 }
  0xbd   :  { %2241 = vmatpush3.bf16.msk.msra.mxu1 %vm2013_vm7, %v2370_v11  ;;  %vm1016_vm8 = vmand %vm503_vm2, %vm760_vm3  ;;  %vm488_vm3 = vcmp.ge.s32.totalorder %v229_v55, %v2396_v5  ;;  %vm519_vm7 = vcmp.ge.s32.totalorder %v260_v59, %v2396_v5  ;;  %v302_v55 = vadd.s32 1216, %v2392_v1 }
  0xbe   :  { %vm1017_vm11 = vmand %vm504_vm5, %vm761_vm6 }
  0xbf   :  { %vm1999_vm14 = vmpackc.low %vm1017_vm11, %vm1016_vm8  ;;  %vm776_vm8 = vcmp.lt.s32.totalorder %v260_v59, %v2401_v7  ;;  %vm777_vm11 = vcmp.lt.s32.totalorder %v261_v61, %v2401_v7  ;;  %v286_v59 = vadd.s32 1088, %v2392_v1 }
  0xc0   :  { %2220 = vmatprep.subr.msk.bf16.mxu0 %vm1999_vm14, %v2370_v11  ;;  %vm2918_vm15 = vmand %vm535_vm9, %vm792_vm10  ;;  %vm520_vm10 = vcmp.ge.s32.totalorder %v261_v61, %v2396_v5  ;;  %vm553_vm14 = vcmp.ge.s32.totalorder %v294_v3, %v2396_v5  ;;  %v319_v61 = vadd.s32 1352, %v2392_v1 }
  0xc1   :  { %vm1049_vm2 = vmand %vm536_vm12, %vm793_vm13 }
  0xc2   :  { %vm2031_vm5 = vmpackc.low %vm1049_vm2, %vm2918_vm15  ;;  %vm810_vm15 = vcmp.lt.s32.totalorder %v294_v3, %v2401_v7  ;;  %vm811_vm2 = vcmp.lt.s32.totalorder %v295_v42, %v2401_v7  ;;  %v289_v3 = vadd.s32 1112, %v2392_v1 }
  0xc3   :  { %2242 = vmatprep.subr.msk.bf16.mxu1 %vm2031_vm5, %v2370_v11  ;;  %vm1000_vm6 = vmand %vm487_vm0, %vm744_vm1  ;;  %vm554_vm1 = vcmp.ge.s32.totalorder %v295_v42, %v2396_v5  ;;  %vm585_vm5 = vcmp.ge.s32.totalorder %v326_v10, %v2396_v5  ;;  %v306_v42 = vadd.s32 1248, %v2392_v1 }
  0xc4   :  { %vm1001_vm9 = vmand %vm488_vm3, %vm745_vm4 }
  0xc5   :  { %vm1983_vm12 = vmpackc.low %vm1001_vm9, %vm1000_vm6  ;;  %vm842_vm6 = vcmp.lt.s32.totalorder %v326_v10, %v2401_v7  ;;  %vm843_vm9 = vcmp.lt.s32.totalorder %v327_v13, %v2401_v7  ;;  %v339_v10 = vadd.s32 1512, %v2392_v1 }
  0xc6   :  { %2221 = vmatpush3.bf16.msk.msra.mxu0 %vm1983_vm12, %v2370_v11  ;;  %vm1032_vm13 = vmand %vm519_vm7, %vm776_vm8  ;;  %vm586_vm8 = vcmp.ge.s32.totalorder %v327_v13, %v2396_v5  ;;  %vm537_vm12 = vcmp.ge.s32.totalorder %v278_v17, %v2396_v5  ;;  %v291_v13 = vadd.s32 1128, %v2392_v1 }
  0xc7   :  { %vm1033_vm0 = vmand %vm520_vm10, %vm777_vm11 }
  0xc8   :  { %vm2015_vm3 = vmpackc.low %vm1033_vm0, %vm1032_vm13  ;;  %vm794_vm13 = vcmp.lt.s32.totalorder %v278_v17, %v2401_v7  ;;  %vm795_vm0 = vcmp.lt.s32.totalorder %v279_v19, %v2401_v7  ;;  %v308_v17 = vadd.s32 1264, %v2392_v1 }
  0xc9   :  { %2243 = vmatpush3.bf16.msk.msra.mxu1 %vm2015_vm3, %v2370_v11  ;;  %1677 = vmatmul.mubr.bf16.vlgmr.msra.gmra.mrb[4].mxu0 %v137_v9  ;;  %vm1066_vm4 = vmand %vm553_vm14, %vm810_vm15  ;;  %vm538_vm15 = vcmp.ge.s32.totalorder %v279_v19, %v2396_v5  ;;  %vm569_vm3 = vcmp.ge.s32.totalorder %v310_v21, %v2396_v5  ;;  %v338_v9 = vadd.s32 1504, %v2392_v1  ;;  %v309_v19 = vadd.s32 1272, %v2392_v1 }
  0xca   :  { %vm1067_vm7 = vmand %vm554_vm1, %vm811_vm2  ;;  %1756 = vmatprep.mubr.bf16.mxu0 %v142_v14  ;;  %v322_v14 = vadd.s32 1376, %v2392_v1 }
  0xcb   :  { %vm2049_vm10 = vmpackc.low %vm1067_vm7, %vm1066_vm4  ;;  %vm826_vm4 = vcmp.lt.s32.totalorder %v310_v21, %v2401_v7  ;;  %vm827_vm7 = vcmp.lt.s32.totalorder %v311_v22, %v2401_v7  ;;  %v341_v21 = vadd.s32 1528, %v2392_v1 }
  0xcc   :  { %1717 = vmatmul.mubr.bf16.vlgmr.msra.gmra.mrb[4].mxu1 %v139_v16  ;;  %2250 = vmatprep.subr.msk.bf16.mxu0 %vm2049_vm10, %v2370_v11  ;;  %vm1098_vm11 = vmand %vm585_vm5, %vm842_vm6  ;;  %vm570_vm6 = vcmp.ge.s32.totalorder %v311_v22, %v2396_v5  ;;  %vm555_vm10 = vcmp.ge.s32.totalorder %v296_v23, %v2396_v5  ;;  %v323_v16 = vadd.s32 1384, %v2392_v1  ;;  %v292_v22 = vadd.s32 1136, %v2392_v1 }
  0xcd   :  { %vm1099_vm14 = vmand %vm586_vm8, %vm843_vm9  ;;  %1796 = vmatprep.mubr.bf16.mxu1 %v144_v20  ;;  %v340_v20 = vadd.s32 1520, %v2392_v1 }
  0xce   :  { %vm2081_vm1 = vmpackc.low %vm1099_vm14, %vm1098_vm11  ;;  %vm812_vm11 = vcmp.lt.s32.totalorder %v296_v23, %v2401_v7  ;;  %vm813_vm14 = vcmp.lt.s32.totalorder %v297_v24, %v2401_v7  ;;  %v293_v23 = vadd.s32 1144, %v2392_v1 }
  0xcf   :  { %2272 = vmatprep.subr.msk.bf16.mxu1 %vm2081_vm1, %v2370_v11  ;;  %vm1050_vm2 = vmand %vm537_vm12, %vm794_vm13  ;;  %vm556_vm13 = vcmp.ge.s32.totalorder %v297_v24, %v2396_v5  ;;  %vm587_vm1 = vcmp.ge.s32.totalorder %v328_v25, %v2396_v5  ;;  %v72_v24 = vrot.slane %v2894_v52, %v39_v15  ;;  %v30_v15 = vld [vmem:[%s3475_s0 + $0x68] sm:$0xff] }
  0xd0   :  { %vm1051_vm5 = vmand %vm538_vm15, %vm795_vm0 }
  0xd1   :  { %vm2033_vm8 = vmpackc.low %vm1051_vm5, %vm1050_vm2  ;;  %vm844_vm2 = vcmp.lt.s32.totalorder %v328_v25, %v2401_v7  ;;  %vm845_vm5 = vcmp.lt.s32.totalorder %v329_v26, %v2401_v7  ;;  %v25_v25 = vld [vmem:[%s3475_s0 + $0x40] sm:$0xff] }
  0xd2   :  { %2251 = vmatpush3.bf16.msk.msra.mxu0 %vm2033_vm8, %v2370_v11  ;;  %vm1082_vm9 = vmand %vm569_vm3, %vm826_vm4  ;;  %vm588_vm4 = vcmp.ge.s32.totalorder %v329_v26, %v2396_v5  ;;  %vm539_vm8 = vcmp.ge.s32.totalorder %v280_v27, %v2396_v5  ;;  %v92_v26 = vrot.slane %v2894_v52, %v59_v34  ;;  %v80_v34 = vrot.slane %v2894_v52, %v47_v18 }
  0xd3   :  { %vm1083_vm12 = vmand %vm570_vm6, %vm827_vm7 }
  0xd4   :  { %vm2065_vm15 = vmpackc.low %vm1083_vm12, %vm1082_vm9  ;;  %vm796_vm9 = vcmp.lt.s32.totalorder %v280_v27, %v2401_v7  ;;  %vm797_vm12 = vcmp.lt.s32.totalorder %v281_v28, %v2401_v7  ;;  %v324_v27 = vadd.s32 1392, %v2392_v1  ;;  %v130_v18 = vmul.f32 %v92_v26, %v30_v15 }
  0xd5   :  { %2273 = vmatpush3.bf16.msk.msra.mxu1 %vm2065_vm15, %v2370_v11  ;;  %vm1068_vm0 = vmand %vm555_vm10, %vm812_vm11  ;;  %vm540_vm11 = vcmp.ge.s32.totalorder %v281_v28, %v2396_v5  ;;  %vm571_vm15 = vcmp.ge.s32.totalorder %v312_v29, %v2396_v5  ;;  %v397_v26 = vadd.s32 1976, %v2392_v1  ;;  %v349_v15 = vadd.s32 1592, %v2392_v1 }
  0xd6   :  { %vm1069_vm3 = vmand %vm556_vm13, %vm813_vm14  ;;  %v380_v28 = vadd.s32 1840, %v2392_v1 }
  0xd7   :  { %vm2051_vm6 = vmpackc.low %vm1069_vm3, %vm1068_vm0  ;;  %vm828_vm0 = vcmp.lt.s32.totalorder %v312_v29, %v2401_v7  ;;  %vm829_vm3 = vcmp.lt.s32.totalorder %v313_v30, %v2401_v7  ;;  %v325_v29 = vadd.s32 1400, %v2392_v1 }
  0xd8   :  { %2252 = vmatprep.subr.msk.bf16.mxu0 %vm2051_vm6, %v2370_v11  ;;  %vm1100_vm7 = vmand %vm587_vm1, %vm844_vm2  ;;  %vm572_vm2 = vcmp.ge.s32.totalorder %v313_v30, %v2396_v5  ;;  %vm557_vm6 = vcmp.ge.s32.totalorder %v298_v31, %v2396_v5  ;;  %v125_v30 = vmul.f32 %v72_v24, %v25_v25  ;;  %v365_v24 = vadd.s32 1720, %v2392_v1 }
  0xd9   :  { %vm1101_vm10 = vmand %vm588_vm4, %vm845_vm5  ;;  %v396_v25 = vadd.s32 1968, %v2392_v1 }
  0xda   :  { %vm2083_vm13 = vmpackc.low %vm1101_vm10, %vm1100_vm7  ;;  %vm814_vm7 = vcmp.lt.s32.totalorder %v298_v31, %v2401_v7  ;;  %vm815_vm10 = vcmp.lt.s32.totalorder %v299_v32, %v2401_v7  ;;  %v27_v31 = vld [vmem:[%s3475_s0 + $0x50] sm:$0xff] }
  0xdb   :  { %2274 = vmatprep.subr.msk.bf16.mxu1 %vm2083_vm13, %v2370_v11  ;;  %vm1052_vm14 = vmand %vm539_vm8, %vm796_vm9  ;;  %vm558_vm9 = vcmp.ge.s32.totalorder %v299_v32, %v2396_v5  ;;  %vm589_vm13 = vcmp.ge.s32.totalorder %v330_v33, %v2396_v5  ;;  %v100_v32 = vrot.slane %v2894_v52, %v67_v35  ;;  %v359_v35 = vadd.s32 1672, %v2392_v1 }
  0xdc   :  { %vm1053_vm1 = vmand %vm540_vm11, %vm797_vm12  ;;  %v127_v52 = vmul.f32 %v80_v34, %v27_v31  ;;  %v366_v34 = vadd.s32 1728, %v2392_v1  ;;  %v398_v31 = vadd.s32 1984, %v2392_v1 }
  0xdd   :  { %vm2035_vm4 = vmpackc.low %vm1053_vm1, %vm1052_vm14  ;;  %vm846_vm14 = vcmp.lt.s32.totalorder %v330_v33, %v2401_v7  ;;  %vm847_vm1 = vcmp.lt.s32.totalorder %v331_v36, %v2401_v7  ;;  %v358_v33 = vadd.s32 1664, %v2392_v1 }
  0xde   :  { %2253 = vmatpush3.bf16.msk.msra.mxu0 %vm2035_vm4, %v2370_v11  ;;  %vm1084_vm5 = vmand %vm571_vm15, %vm828_vm0  ;;  %vm590_vm0 = vcmp.ge.s32.totalorder %v331_v36, %v2396_v5  ;;  %vm541_vm4 = vcmp.ge.s32.totalorder %v282_v37, %v2396_v5  ;;  %v32_v36 = vld [vmem:[%s3475_s0 + $0x78] sm:$0xff] }
  0xdf   :  { %vm1085_vm8 = vmand %vm572_vm2, %vm829_vm3 }
  0xe0   :  { %vm2067_vm11 = vmpackc.low %vm1085_vm8, %vm1084_vm5  ;;  %vm798_vm5 = vcmp.lt.s32.totalorder %v282_v37, %v2401_v7  ;;  %vm799_vm8 = vcmp.lt.s32.totalorder %v283_v39, %v2401_v7  ;;  %v141_v37 = vpack.c.bf16 %v125_v30, %v125_v30  ;;  %v367_v30 = vadd.s32 1736, %v2392_v1 }
  0xe1   :  { %2275 = vmatpush3.bf16.msk.msra.mxu1 %vm2067_vm11, %v2370_v11  ;;  %vm1070_vm12 = vmand %vm557_vm6, %vm814_vm7  ;;  %vm542_vm7 = vcmp.ge.s32.totalorder %v283_v39, %v2396_v5  ;;  %vm573_vm11 = vcmp.ge.s32.totalorder %v314_v41, %v2396_v5  ;;  %v390_v39 = vadd.s32 1920, %v2392_v1 }
  0xe2   :  { %vm1071_vm15 = vmand %vm558_vm9, %vm815_vm10 }
  0xe3   :  { %vm2053_vm2 = vmpackc.low %vm1071_vm15, %vm1070_vm12  ;;  %vm830_vm12 = vcmp.lt.s32.totalorder %v314_v41, %v2401_v7  ;;  %vm831_vm15 = vcmp.lt.s32.totalorder %v315_v43, %v2401_v7  ;;  %v132_v41 = vmul.f32 %v100_v32, %v32_v36  ;;  %v399_v32 = vadd.s32 1992, %v2392_v1 }
  0xe4   :  { %2254 = vmatprep.subr.msk.bf16.mxu0 %vm2053_vm2, %v2370_v11  ;;  %vm1102_vm3 = vmand %vm589_vm13, %vm846_vm14  ;;  %vm574_vm14 = vcmp.ge.s32.totalorder %v315_v43, %v2396_v5  ;;  %vm559_vm2 = vcmp.ge.s32.totalorder %v300_v44, %v2396_v5  ;;  %v391_v43 = vadd.s32 1928, %v2392_v1  ;;  %v382_v36 = vadd.s32 1856, %v2392_v1 }
  0xe5   :  { %vm1103_vm6 = vmand %vm590_vm0, %vm847_vm1 }
  0xe6   :  { %vm2085_vm9 = vmpackc.low %vm1103_vm6, %vm1102_vm3  ;;  %vm816_vm3 = vcmp.lt.s32.totalorder %v300_v44, %v2401_v7  ;;  %vm817_vm6 = vcmp.lt.s32.totalorder %v301_v45, %v2401_v7  ;;  %v146_v44 = vpack.c.bf16 %v130_v18, %v130_v18  ;;  %v351_v18 = vadd.s32 1608, %v2392_v1 }
  0xe7   :  { %2276 = vmatprep.subr.msk.bf16.mxu1 %vm2085_vm9, %v2370_v11  ;;  %vm1054_vm10 = vmand %vm541_vm4, %vm798_vm5  ;;  %vm560_vm5 = vcmp.ge.s32.totalorder %v301_v45, %v2396_v5  ;;  %vm591_vm9 = vcmp.ge.s32.totalorder %v332_v46, %v2396_v5  ;;  %v143_v45 = vpack.c.bf16 %v127_v52, %v127_v52  ;;  %v368_v52 = vadd.s32 1744, %v2392_v1 }
  0xe8   :  { %vm1055_vm13 = vmand %vm542_vm7, %vm799_vm8 }
  0xe9   :  { %vm2037_vm0 = vmpackc.low %vm1055_vm13, %vm1054_vm10  ;;  %vm848_vm10 = vcmp.lt.s32.totalorder %v332_v46, %v2401_v7  ;;  %vm849_vm13 = vcmp.lt.s32.totalorder %v333_v47, %v2401_v7  ;;  %v342_v46 = vadd.s32 1536, %v2392_v1 }
  0xea   :  { %2255 = vmatpush3.bf16.msk.msra.mxu0 %vm2037_vm0, %v2370_v11  ;;  %vm1086_vm1 = vmand %vm573_vm11, %vm830_vm12  ;;  %vm592_vm12 = vcmp.ge.s32.totalorder %v333_v47, %v2396_v5  ;;  %vm543_vm0 = vcmp.ge.s32.totalorder %v284_v48, %v2396_v5  ;;  %v343_v47 = vadd.s32 1544, %v2392_v1 }
  0xeb   :  { %vm1087_vm4 = vmand %vm574_vm14, %vm831_vm15 }
  0xec   :  { %vm2069_vm7 = vmpackc.low %vm1087_vm4, %vm1086_vm1  ;;  %vm800_vm1 = vcmp.lt.s32.totalorder %v284_v48, %v2401_v7  ;;  %vm801_vm4 = vcmp.lt.s32.totalorder %v285_v49, %v2401_v7  ;;  %v148_v48 = vpack.c.bf16 %v132_v41, %v132_v41  ;;  %v401_v41 = vadd.s32 2008, %v2392_v1 }
  0xed   :  { %2277 = vmatpush3.bf16.msk.msra.mxu1 %vm2069_vm7, %v2370_v11  ;;  %vm1072_vm8 = vmand %vm559_vm2, %vm816_vm3  ;;  %vm544_vm3 = vcmp.ge.s32.totalorder %v285_v49, %v2396_v5  ;;  %vm575_vm7 = vcmp.ge.s32.totalorder %v316_v51, %v2396_v5  ;;  %v374_v49 = vadd.s32 1792, %v2392_v1 }
  0xee   :  { %vm1073_vm11 = vmand %vm560_vm5, %vm817_vm6 }
  0xef   :  { %vm2055_vm14 = vmpackc.low %vm1073_vm11, %vm1072_vm8  ;;  %vm832_vm8 = vcmp.lt.s32.totalorder %v316_v51, %v2401_v7  ;;  %vm833_vm11 = vcmp.lt.s32.totalorder %v317_v53, %v2401_v7  ;;  %v375_v51 = vadd.s32 1800, %v2392_v1 }
  0xf0   :  { %2256 = vmatprep.subr.msk.bf16.mxu0 %vm2055_vm14, %v2370_v11  ;;  %vm1104_vm15 = vmand %vm591_vm9, %vm848_vm10  ;;  %vm576_vm10 = vcmp.ge.s32.totalorder %v317_v53, %v2396_v5  ;;  %vm561_vm14 = vcmp.ge.s32.totalorder %v302_v55, %v2396_v5  ;;  %v360_v53 = vadd.s32 1680, %v2392_v1 }
  0xf1   :  { %vm1105_vm2 = vmand %vm592_vm12, %vm849_vm13 }
  0xf2   :  { %vm2087_vm5 = vmpackc.low %vm1105_vm2, %vm1104_vm15  ;;  %vm818_vm15 = vcmp.lt.s32.totalorder %v302_v55, %v2401_v7  ;;  %vm819_vm2 = vcmp.lt.s32.totalorder %v303_v56, %v2401_v7  ;;  %v361_v55 = vadd.s32 1688, %v2392_v1 }
  0xf3   :  { %2278 = vmatprep.subr.msk.bf16.mxu1 %vm2087_vm5, %v2370_v11  ;;  %vm1056_vm6 = vmand %vm543_vm0, %vm800_vm1  ;;  %vm562_vm1 = vcmp.ge.s32.totalorder %v303_v56, %v2396_v5  ;;  %vm593_vm5 = vcmp.ge.s32.totalorder %v334_v57, %v2396_v5  ;;  %v392_v56 = vadd.s32 1936, %v2392_v1 }
  0xf4   :  { %vm1057_vm9 = vmand %vm544_vm3, %vm801_vm4 }
  0xf5   :  { %vm2039_vm12 = vmpackc.low %vm1057_vm9, %vm1056_vm6  ;;  %vm850_vm6 = vcmp.lt.s32.totalorder %v334_v57, %v2401_v7  ;;  %vm851_vm9 = vcmp.lt.s32.totalorder %v335_v58, %v2401_v7  ;;  %v393_v57 = vadd.s32 1944, %v2392_v1 }
  0xf6   :  { %2257 = vmatpush3.bf16.msk.msra.mxu0 %vm2039_vm12, %v2370_v11  ;;  %vm1088_vm13 = vmand %vm575_vm7, %vm832_vm8  ;;  %vm594_vm8 = vcmp.ge.s32.totalorder %v335_v58, %v2396_v5  ;;  %vm545_vm12 = vcmp.ge.s32.totalorder %v286_v59, %v2396_v5  ;;  %v344_v58 = vadd.s32 1552, %v2392_v1 }
  0xf7   :  { %vm1089_vm0 = vmand %vm576_vm10, %vm833_vm11 }
  0xf8   :  { %vm2071_vm3 = vmpackc.low %vm1089_vm0, %vm1088_vm13  ;;  %vm802_vm13 = vcmp.lt.s32.totalorder %v286_v59, %v2401_v7  ;;  %vm803_vm0 = vcmp.lt.s32.totalorder %v287_v38, %v2401_v7  ;;  %v345_v59 = vadd.s32 1560, %v2392_v1 }
  0xf9   :  { %2279 = vmatpush3.bf16.msk.msra.mxu1 %vm2071_vm3, %v2370_v11  ;;  %vm1074_vm4 = vmand %vm561_vm14, %vm818_vm15  ;;  %vm546_vm15 = vcmp.ge.s32.totalorder %v287_v38, %v2396_v5  ;;  %vm577_vm3 = vcmp.ge.s32.totalorder %v318_v60, %v2396_v5  ;;  %v376_v38 = vadd.s32 1808, %v2392_v1 }
  0xfa   :  { %vm1075_vm7 = vmand %vm562_vm1, %vm819_vm2 }
  0xfb   :  { %vm2057_vm10 = vmpackc.low %vm1075_vm7, %vm1074_vm4  ;;  %vm834_vm4 = vcmp.lt.s32.totalorder %v318_v60, %v2401_v7  ;;  %vm835_vm7 = vcmp.lt.s32.totalorder %v319_v61, %v2401_v7  ;;  %v377_v60 = vadd.s32 1816, %v2392_v1 }
  0xfc   :  { %2258 = vmatprep.subr.msk.bf16.mxu0 %vm2057_vm10, %v2370_v11  ;;  %vm1106_vm11 = vmand %vm593_vm5, %vm850_vm6  ;;  %vm578_vm6 = vcmp.ge.s32.totalorder %v319_v61, %v2396_v5  ;;  %vm563_vm10 = vcmp.ge.s32.totalorder %v304_v40, %v2396_v5  ;;  %v362_v61 = vadd.s32 1696, %v2392_v1 }
  0xfd   :  { %vm1107_vm14 = vmand %vm594_vm8, %vm851_vm9 }
  0xfe   :  { %vm2089_vm1 = vmpackc.low %vm1107_vm14, %vm1106_vm11  ;;  %vm820_vm11 = vcmp.lt.s32.totalorder %v304_v40, %v2401_v7  ;;  %vm821_vm14 = vcmp.lt.s32.totalorder %v305_v62, %v2401_v7  ;;  %v363_v40 = vadd.s32 1704, %v2392_v1 }
  0xff   :  { %2280 = vmatprep.subr.msk.bf16.mxu1 %vm2089_vm1, %v2370_v11  ;;  %vm1058_vm2 = vmand %vm545_vm12, %vm802_vm13  ;;  %vm564_vm13 = vcmp.ge.s32.totalorder %v305_v62, %v2396_v5  ;;  %vm595_vm1 = vcmp.ge.s32.totalorder %v336_v63, %v2396_v5 }
 0x100   :  { %vm1059_vm5 = vmand %vm546_vm15, %vm803_vm0 }
 0x101   :  { %vm2041_vm8 = vmpackc.low %vm1059_vm5, %vm1058_vm2  ;;  %vm852_vm2 = vcmp.lt.s32.totalorder %v336_v63, %v2401_v7  ;;  %vm853_vm5 = vcmp.lt.s32.totalorder %v337_v0, %v2401_v7  ;;  %v394_v63 = vadd.s32 1952, %v2392_v1 }
 0x102   :  { %2259 = vmatpush3.bf16.msk.msra.mxu0 %vm2041_vm8, %v2370_v11  ;;  %vm1090_vm9 = vmand %vm577_vm3, %vm834_vm4  ;;  %vm596_vm4 = vcmp.ge.s32.totalorder %v337_v0, %v2396_v5  ;;  %vm547_vm8 = vcmp.ge.s32.totalorder %v288_v2, %v2396_v5  ;;  %v1563_v0 = vstv %s3477_s2 }
 0x103   :  { %vm1091_vm12 = vmand %vm578_vm6, %vm835_vm7 }
 0x104   :  { %vm2073_vm15 = vmpackc.low %vm1091_vm12, %vm1090_vm9  ;;  %vm804_vm9 = vcmp.lt.s32.totalorder %v288_v2, %v2401_v7  ;;  %vm805_vm12 = vcmp.lt.s32.totalorder %v289_v3, %v2401_v7 }
 0x105   :  { %2281 = vmatpush3.bf16.msk.msra.mxu1 %vm2073_vm15, %v2370_v11  ;;  %vm1076_vm0 = vmand %vm563_vm10, %vm820_vm11  ;;  %vm548_vm11 = vcmp.ge.s32.totalorder %v289_v3, %v2396_v5  ;;  %vm579_vm15 = vcmp.ge.s32.totalorder %v320_v4, %v2396_v5 }
 0x106   :  { %vm1077_vm3 = vmand %vm564_vm13, %vm821_vm14 }
 0x107   :  { %vm2059_vm6 = vmpackc.low %vm1077_vm3, %vm1076_vm0  ;;  %vm836_vm0 = vcmp.lt.s32.totalorder %v320_v4, %v2401_v7  ;;  %vm837_vm3 = vcmp.lt.s32.totalorder %v321_v6, %v2401_v7  ;;  %v395_v4 = vadd.s32 1960, %v2392_v1 }
 0x108   :  { %2260 = vmatprep.subr.msk.bf16.mxu0 %vm2059_vm6, %v2370_v11  ;;  %vm1108_vm7 = vmand %vm595_vm1, %vm852_vm2  ;;  %vm580_vm2 = vcmp.ge.s32.totalorder %v321_v6, %v2396_v5  ;;  %vm565_vm6 = vcmp.ge.s32.totalorder %v306_v42, %v2396_v5 }
 0x109   :  { %vm1109_vm10 = vmand %vm596_vm4, %vm853_vm5 }
 0x10a   :  { %vm2091_vm13 = vmpackc.low %vm1109_vm10, %vm1108_vm7  ;;  %vm822_vm7 = vcmp.lt.s32.totalorder %v306_v42, %v2401_v7  ;;  %vm823_vm10 = vcmp.lt.s32.totalorder %v307_v8, %v2401_v7 }
 0x10b   :  { %2282 = vmatprep.subr.msk.bf16.mxu1 %vm2091_vm13, %v2370_v11  ;;  %vm1060_vm14 = vmand %vm547_vm8, %vm804_vm9  ;;  %vm566_vm9 = vcmp.ge.s32.totalorder %v307_v8, %v2396_v5  ;;  %vm597_vm13 = vcmp.ge.s32.totalorder %v338_v9, %v2396_v5 }
 0x10c   :  { %vm1061_vm1 = vmand %vm548_vm11, %vm805_vm12 }
 0x10d   :  { %vm2043_vm4 = vmpackc.low %vm1061_vm1, %vm1060_vm14  ;;  %vm854_vm14 = vcmp.lt.s32.totalorder %v338_v9, %v2401_v7  ;;  %vm855_vm1 = vcmp.lt.s32.totalorder %v339_v10, %v2401_v7 }
 0x10e   :  { %2261 = vmatpush3.bf16.msk.msra.mxu0 %vm2043_vm4, %v2370_v11  ;;  %vm1092_vm5 = vmand %vm579_vm15, %vm836_vm0  ;;  %vm598_vm0 = vcmp.ge.s32.totalorder %v339_v10, %v2396_v5  ;;  %vm549_vm4 = vcmp.ge.s32.totalorder %v290_v12, %v2396_v5  ;;  %v346_v10 = vadd.s32 1568, %v2392_v1 }
 0x10f   :  { %vm1093_vm8 = vmand %vm580_vm2, %vm837_vm3 }
 0x110   :  { %vm2075_vm11 = vmpackc.low %vm1093_vm8, %vm1092_vm5  ;;  %vm806_vm5 = vcmp.lt.s32.totalorder %v290_v12, %v2401_v7  ;;  %vm807_vm8 = vcmp.lt.s32.totalorder %v291_v13, %v2401_v7 }
 0x111   :  { %2283 = vmatpush3.bf16.msk.msra.mxu1 %vm2075_vm11, %v2370_v11  ;;  %vm1078_vm12 = vmand %vm565_vm6, %vm822_vm7  ;;  %vm550_vm7 = vcmp.ge.s32.totalorder %v291_v13, %v2396_v5  ;;  %vm581_vm11 = vcmp.ge.s32.totalorder %v322_v14, %v2396_v5 }
 0x112   :  { %vm1079_vm15 = vmand %vm566_vm9, %vm823_vm10 }
 0x113   :  { %vm2061_vm2 = vmpackc.low %vm1079_vm15, %vm1078_vm12  ;;  %vm838_vm12 = vcmp.lt.s32.totalorder %v322_v14, %v2401_v7  ;;  %vm839_vm15 = vcmp.lt.s32.totalorder %v323_v16, %v2401_v7  ;;  %v347_v14 = vadd.s32 1576, %v2392_v1 }
 0x114   :  { %2262 = vmatprep.subr.msk.bf16.mxu0 %vm2061_vm2, %v2370_v11  ;;  %vm1110_vm3 = vmand %vm597_vm13, %vm854_vm14  ;;  %vm582_vm14 = vcmp.ge.s32.totalorder %v323_v16, %v2396_v5  ;;  %vm567_vm2 = vcmp.ge.s32.totalorder %v308_v17, %v2396_v5 }
 0x115   :  { %vm1111_vm6 = vmand %vm598_vm0, %vm855_vm1 }
 0x116   :  { %vm2093_vm9 = vmpackc.low %vm1111_vm6, %vm1110_vm3  ;;  %vm824_vm3 = vcmp.lt.s32.totalorder %v308_v17, %v2401_v7  ;;  %vm825_vm6 = vcmp.lt.s32.totalorder %v309_v19, %v2401_v7 }
 0x117   :  { %2284 = vmatprep.subr.msk.bf16.mxu1 %vm2093_vm9, %v2370_v11  ;;  %vm1062_vm10 = vmand %vm549_vm4, %vm806_vm5  ;;  %vm568_vm5 = vcmp.ge.s32.totalorder %v309_v19, %v2396_v5  ;;  %vm599_vm9 = vcmp.ge.s32.totalorder %v340_v20, %v2396_v5 }
 0x118   :  { %vm1063_vm13 = vmand %vm550_vm7, %vm807_vm8 }
 0x119   :  { %vm2045_vm0 = vmpackc.low %vm1063_vm13, %vm1062_vm10  ;;  %vm856_vm10 = vcmp.lt.s32.totalorder %v340_v20, %v2401_v7  ;;  %vm857_vm13 = vcmp.lt.s32.totalorder %v341_v21, %v2401_v7  ;;  %v378_v20 = vadd.s32 1824, %v2392_v1 }
 0x11a   :  { %2263 = vmatpush3.bf16.msk.msra.mxu0 %vm2045_vm0, %v2370_v11  ;;  %vm1094_vm1 = vmand %vm581_vm11, %vm838_vm12  ;;  %vm600_vm12 = vcmp.ge.s32.totalorder %v341_v21, %v2396_v5  ;;  %vm551_vm0 = vcmp.ge.s32.totalorder %v292_v22, %v2396_v5 }
 0x11b   :  { %vm1095_vm4 = vmand %vm582_vm14, %vm839_vm15 }
 0x11c   :  { %vm2077_vm7 = vmpackc.low %vm1095_vm4, %vm1094_vm1  ;;  %vm808_vm1 = vcmp.lt.s32.totalorder %v292_v22, %v2401_v7  ;;  %vm809_vm4 = vcmp.lt.s32.totalorder %v293_v23, %v2401_v7  ;;  %v379_v22 = vadd.s32 1832, %v2392_v1 }
 0x11d   :  { %2285 = vmatpush3.bf16.msk.msra.mxu1 %vm2077_vm7, %v2370_v11  ;;  %vm1080_vm8 = vmand %vm567_vm2, %vm824_vm3  ;;  %vm552_vm3 = vcmp.ge.s32.totalorder %v293_v23, %v2396_v5  ;;  %vm583_vm7 = vcmp.ge.s32.totalorder %v324_v27, %v2396_v5  ;;  %v364_v23 = vadd.s32 1712, %v2392_v1 }
 0x11e   :  { %vm1081_vm11 = vmand %vm568_vm5, %vm825_vm6 }
 0x11f   :  { %vm2063_vm14 = vmpackc.low %vm1081_vm11, %vm1080_vm8  ;;  %vm840_vm8 = vcmp.lt.s32.totalorder %v324_v27, %v2401_v7  ;;  %vm841_vm11 = vcmp.lt.s32.totalorder %v325_v29, %v2401_v7  ;;  %v348_v27 = vadd.s32 1584, %v2392_v1 }
 0x120   :  { %2264 = vmatprep.subr.msk.bf16.mxu0 %vm2063_vm14, %v2370_v11  ;;  %vm3178_vm15 = vmand %vm599_vm9, %vm856_vm10  ;;  %vm584_vm10 = vcmp.ge.s32.totalorder %v325_v29, %v2396_v5  ;;  %vm617_vm14 = vcmp.ge.s32.totalorder %v358_v33, %v2396_v5  ;;  %v381_v29 = vadd.s32 1848, %v2392_v1 }
 0x121   :  { %vm1113_vm2 = vmand %vm600_vm12, %vm857_vm13 }
 0x122   :  { %vm2095_vm5 = vmpackc.low %vm1113_vm2, %vm3178_vm15  ;;  %vm874_vm15 = vcmp.lt.s32.totalorder %v358_v33, %v2401_v7  ;;  %vm875_vm2 = vcmp.lt.s32.totalorder %v359_v35, %v2401_v7  ;;  %v350_v33 = vadd.s32 1600, %v2392_v1 }
 0x123   :  { %2286 = vmatprep.subr.msk.bf16.mxu1 %vm2095_vm5, %v2370_v11  ;;  %vm1064_vm6 = vmand %vm551_vm0, %vm808_vm1  ;;  %vm618_vm1 = vcmp.ge.s32.totalorder %v359_v35, %v2396_v5  ;;  %vm649_vm5 = vcmp.ge.s32.totalorder %v390_v39, %v2396_v5  ;;  %v383_v35 = vadd.s32 1864, %v2392_v1 }
 0x124   :  { %vm1065_vm9 = vmand %vm552_vm3, %vm809_vm4 }
 0x125   :  { %vm2047_vm12 = vmpackc.low %vm1065_vm9, %vm1064_vm6  ;;  %vm906_vm6 = vcmp.lt.s32.totalorder %v390_v39, %v2401_v7  ;;  %vm907_vm9 = vcmp.lt.s32.totalorder %v391_v43, %v2401_v7  ;;  %v400_v39 = vadd.s32 2000, %v2392_v1 }
 0x126   :  { %2265 = vmatpush3.bf16.msk.msra.mxu0 %vm2047_vm12, %v2370_v11  ;;  %vm1096_vm13 = vmand %vm583_vm7, %vm840_vm8  ;;  %vm650_vm8 = vcmp.ge.s32.totalorder %v391_v43, %v2396_v5  ;;  %vm601_vm12 = vcmp.ge.s32.totalorder %v342_v46, %v2396_v5  ;;  %v352_v43 = vadd.s32 1616, %v2392_v1 }
 0x127   :  { %vm1097_vm0 = vmand %vm584_vm10, %vm841_vm11 }
 0x128   :  { %vm2079_vm3 = vmpackc.low %vm1097_vm0, %vm1096_vm13  ;;  %vm858_vm13 = vcmp.lt.s32.totalorder %v342_v46, %v2401_v7  ;;  %vm859_vm0 = vcmp.lt.s32.totalorder %v343_v47, %v2401_v7  ;;  %v385_v46 = vadd.s32 1880, %v2392_v1 }
 0x129   :  { %2287 = vmatpush3.bf16.msk.msra.mxu1 %vm2079_vm3, %v2370_v11  ;;  %1757 = vmatmul.mubr.bf16.vlgmr.msra.gmra.mrb[8].mxu0 %v141_v37  ;;  %vm1130_vm4 = vmand %vm617_vm14, %vm874_vm15  ;;  %vm602_vm15 = vcmp.ge.s32.totalorder %v343_v47, %v2396_v5  ;;  %vm633_vm3 = vcmp.ge.s32.totalorder %v374_v49, %v2396_v5  ;;  %v369_v37 = vadd.s32 1752, %v2392_v1  ;;  %v370_v47 = vadd.s32 1760, %v2392_v1 }
 0x12a   :  { %vm1131_vm7 = vmand %vm618_vm1, %vm875_vm2  ;;  %1836 = vmatprep.mubr.bf16.mxu0 %v146_v44  ;;  %v353_v44 = vadd.s32 1624, %v2392_v1 }
 0x12b   :  { %vm2113_vm10 = vmpackc.low %vm1131_vm7, %vm1130_vm4  ;;  %vm890_vm4 = vcmp.lt.s32.totalorder %v374_v49, %v2401_v7  ;;  %vm891_vm7 = vcmp.lt.s32.totalorder %v375_v51, %v2401_v7  ;;  %v402_v49 = vadd.s32 2016, %v2392_v1 }
 0x12c   :  { %1797 = vmatmul.mubr.bf16.vlgmr.msra.gmra.mrb[8].mxu1 %v143_v45  ;;  %2294 = vmatprep.subr.msk.bf16.mxu0 %vm2113_vm10, %v2370_v11  ;;  %vm1162_vm11 = vmand %vm649_vm5, %vm906_vm6  ;;  %vm634_vm6 = vcmp.ge.s32.totalorder %v375_v51, %v2396_v5  ;;  %vm619_vm10 = vcmp.ge.s32.totalorder %v360_v53, %v2396_v5  ;;  %v384_v45 = vadd.s32 1872, %v2392_v1  ;;  %v403_v51 = vadd.s32 2024, %v2392_v1 }
 0x12d   :  { %vm1163_vm14 = vmand %vm650_vm8, %vm907_vm9  ;;  %1876 = vmatprep.mubr.bf16.mxu1 %v148_v48  ;;  %v371_v48 = vadd.s32 1768, %v2392_v1 }
 0x12e   :  { %vm2145_vm1 = vmpackc.low %vm1163_vm14, %vm1162_vm11  ;;  %vm876_vm11 = vcmp.lt.s32.totalorder %v360_v53, %v2401_v7  ;;  %vm877_vm14 = vcmp.lt.s32.totalorder %v361_v55, %v2401_v7  ;;  %v354_v53 = vadd.s32 1632, %v2392_v1 }
 0x12f   :  { %2316 = vmatprep.subr.msk.bf16.mxu1 %vm2145_vm1, %v2370_v11  ;;  %vm1114_vm2 = vmand %vm601_vm12, %vm858_vm13  ;;  %vm620_vm13 = vcmp.ge.s32.totalorder %v361_v55, %v2396_v5  ;;  %vm651_vm1 = vcmp.ge.s32.totalorder %v392_v56, %v2396_v5  ;;  %v355_v55 = vadd.s32 1640, %v2392_v1 }
 0x130   :  { %vm1115_vm5 = vmand %vm602_vm15, %vm859_vm0 }
 0x131   :  { %vm2097_vm8 = vmpackc.low %vm1115_vm5, %vm1114_vm2  ;;  %vm908_vm2 = vcmp.lt.s32.totalorder %v392_v56, %v2401_v7  ;;  %vm909_vm5 = vcmp.lt.s32.totalorder %v393_v57, %v2401_v7  ;;  %v386_v56 = vadd.s32 1888, %v2392_v1 }
 0x132   :  { %2295 = vmatpush3.bf16.msk.msra.mxu0 %vm2097_vm8, %v2370_v11  ;;  %vm1146_vm9 = vmand %vm633_vm3, %vm890_vm4  ;;  %vm652_vm4 = vcmp.ge.s32.totalorder %v393_v57, %v2396_v5  ;;  %vm603_vm8 = vcmp.ge.s32.totalorder %v344_v58, %v2396_v5  ;;  %v387_v57 = vadd.s32 1896, %v2392_v1 }
 0x133   :  { %vm1147_vm12 = vmand %vm634_vm6, %vm891_vm7 }
 0x134   :  { %vm2129_vm15 = vmpackc.low %vm1147_vm12, %vm1146_vm9  ;;  %vm860_vm9 = vcmp.lt.s32.totalorder %v344_v58, %v2401_v7  ;;  %vm861_vm12 = vcmp.lt.s32.totalorder %v345_v59, %v2401_v7  ;;  %v372_v58 = vadd.s32 1776, %v2392_v1 }
 0x135   :  { %2317 = vmatpush3.bf16.msk.msra.mxu1 %vm2129_vm15, %v2370_v11  ;;  %vm1132_vm0 = vmand %vm619_vm10, %vm876_vm11  ;;  %vm604_vm11 = vcmp.ge.s32.totalorder %v345_v59, %v2396_v5  ;;  %vm635_vm15 = vcmp.ge.s32.totalorder %v376_v38, %v2396_v5  ;;  %v373_v59 = vadd.s32 1784, %v2392_v1 }
 0x136   :  { %vm1133_vm3 = vmand %vm620_vm13, %vm877_vm14 }
 0x137   :  { %vm2115_vm6 = vmpackc.low %vm1133_vm3, %vm1132_vm0  ;;  %vm892_vm0 = vcmp.lt.s32.totalorder %v376_v38, %v2401_v7  ;;  %vm893_vm3 = vcmp.lt.s32.totalorder %v377_v60, %v2401_v7  ;;  %v404_v38 = vadd.s32 2032, %v2392_v1 }
 0x138   :  { %2296 = vmatprep.subr.msk.bf16.mxu0 %vm2115_vm6, %v2370_v11  ;;  %vm1164_vm7 = vmand %vm651_vm1, %vm908_vm2  ;;  %vm636_vm2 = vcmp.ge.s32.totalorder %v377_v60, %v2396_v5  ;;  %vm621_vm6 = vcmp.ge.s32.totalorder %v362_v61, %v2396_v5  ;;  %v405_v60 = vadd.s32 2040, %v2392_v1 }
 0x139   :  { %vm1165_vm10 = vmand %vm652_vm4, %vm909_vm5 }
 0x13a   :  { %vm2147_vm13 = vmpackc.low %vm1165_vm10, %vm1164_vm7  ;;  %vm878_vm7 = vcmp.lt.s32.totalorder %v362_v61, %v2401_v7  ;;  %vm879_vm10 = vcmp.lt.s32.totalorder %v363_v40, %v2401_v7  ;;  %v356_v61 = vadd.s32 1648, %v2392_v1 }
 0x13b   :  { %2318 = vmatprep.subr.msk.bf16.mxu1 %vm2147_vm13, %v2370_v11  ;;  %vm1116_vm14 = vmand %vm603_vm8, %vm860_vm9  ;;  %vm622_vm9 = vcmp.ge.s32.totalorder %v363_v40, %v2396_v5  ;;  %vm653_vm13 = vcmp.ge.s32.totalorder %v394_v63, %v2396_v5  ;;  %v357_v40 = vadd.s32 1656, %v2392_v1 }
 0x13c   :  { %vm1117_vm1 = vmand %vm604_vm11, %vm861_vm12  ;;  %v2178_v62 = vpop.f32.mrb[0].mxu0 }
 0x13d   :  { %vm2099_vm4 = vmpackc.low %vm1117_vm1, %vm1116_vm14  ;;  %v2179_v2 = vpop.f32.mrb[1].mxu0  ;;  %vm910_vm14 = vcmp.lt.s32.totalorder %v394_v63, %v2401_v7  ;;  %vm911_vm1 = vcmp.lt.s32.totalorder %v395_v4, %v2401_v7 }
 0x13e   :  { %2297 = vmatpush3.bf16.msk.msra.mxu0 %vm2099_vm4, %v2370_v11  ;;  %vm3271_vm5 = vmand %vm635_vm15, %vm892_vm0  ;;  %v2180_v6 = vadd.f32 %v2179_v2, %v2178_v62  ;;  %v2181_v42 = vpop.f32.mrb[2].mxu0  ;;  %vm654_vm0 = vcmp.ge.s32.totalorder %v395_v4, %v2396_v5  ;;  %vm605_vm4 = vcmp.ge.s32.totalorder %v346_v10, %v2396_v5  ;;  %v2345_v62 = vld [vmem:[%s3476_s1 + $0x8] sm:$0xff]  ;;  %v388_v2 = vadd.s32 1904, %v2392_v1 }
 0x13f   :  { %vm1149_vm8 = vmand %vm636_vm2, %vm893_vm3  ;;  %v2200_v8 = vpop.f32.mrb[0].mxu1  ;;  %v2182_v9 = vpop.f32.mrb[3].mxu0  ;;  %v88_v63 = vrot.slane %v2345_v62, %v55_v50  ;;  %v389_v50 = vadd.s32 1912, %v2392_v1  ;;  %v96_v3 = vrot.slane %v2345_v62, %v63_v54 }
 0x140   :  { %vm2131_vm11 = vmpackc.low %vm1149_vm8, %vm3271_vm5  ;;  %v1599_v12 = vadd.f32 %v2180_v6, %v1563_v0  ;;  %v2201_v13 = vpop.f32.mrb[1].mxu1  ;;  %vm862_vm5 = vcmp.lt.s32.totalorder %v346_v10, %v2401_v7  ;;  %vm863_vm8 = vcmp.lt.s32.totalorder %v347_v14, %v2401_v7  ;;  %v29_v0 = vld [vmem:[%s3475_s0 + $0x60] sm:$0xff]  ;;  %v31_v6 = vld [vmem:[%s3475_s0 + $0x70] sm:$0xff]  ;;  %s2371_s0 = smov [#allocation3]  }
 0x141   :  { %2319 = vmatpush3.bf16.msk.msra.mxu1 %vm2131_vm11, %v2370_v11  ;;  %vm1134_vm12 = vmand %vm621_vm6, %vm878_vm7  ;;  %v2202_v16 = vadd.f32 %v2201_v13, %v2200_v8  ;;  %v2203_v17 = vpop.f32.mrb[2].mxu1  ;;  %vm606_vm7 = vcmp.ge.s32.totalorder %v347_v14, %v2396_v5  ;;  %vm637_vm11 = vcmp.ge.s32.totalorder %v378_v20, %v2396_v5  ;;  %v129_v4 = vmul.f32 %v88_v63, %v29_v0  ;;  %s1897_s25 = sshll.u32 %s2371_s0, 4  ;;  %s1898_s25 = int_to_ptr.vmem [resolvable:$true] %s1897_s25 }
 0x142   :  { %vm1135_vm15 = vmand %vm622_vm9, %vm879_vm10  ;;  %v2204_v19 = vpop.f32.mrb[3].mxu1  ;;  %v131_v1 = vmul.f32 %v96_v3, %v31_v6  ;;  %s2346_s26 = scalar_lea.vmem %s1898_s25, 128  ;;  %p2351_p1 = scmp.lt.s32.totalorder %s1898_s25, %s1898_s25 }
 0x143   :  { %vm2117_vm2 = vmpackc.low %vm1135_vm15, %vm1134_vm12  ;;  %v3294_v21 = vadd.f32 %v2202_v16, %v1599_v12  ;;  %vm894_vm12 = vcmp.lt.s32.totalorder %v378_v20, %v2401_v7  ;;  %vm895_vm15 = vcmp.lt.s32.totalorder %v379_v22, %v2401_v7  ;;  %v145_v54 = vpack.c.bf16 %v129_v4, %v129_v4  ;;  %p2347_p0 = scmp.ne.s32.totalorder %s1898_s25, %s2346_s26  ;;  %p2352_p2 = scmp.lt.s32.totalorder %s2346_s26, %s2346_s26 }
 0x144   :  { %2298 = vmatprep.subr.msk.bf16.mxu0 %vm2117_vm2, %v2370_v11  ;;  %vm1166_vm3 = vmand %vm653_vm13, %vm910_vm14  ;;  %vm638_vm14 = vcmp.ge.s32.totalorder %v379_v22, %v2396_v5  ;;  %vm623_vm2 = vcmp.ge.s32.totalorder %v364_v23, %v2396_v5  ;;  %v147_v42 = vpack.c.bf16 %v131_v1, %v131_v1 }
 0x145   :  { %vm1167_vm6 = vmand %vm654_vm0, %vm911_vm1  ;;  %p2353_p3 = por %p2352_p2, %p2351_p1 }
 0x146   :  { %vm2149_vm9 = vmpackc.low %vm1167_vm6, %vm1166_vm3  ;;  %vm880_vm3 = vcmp.lt.s32.totalorder %v364_v23, %v2401_v7  ;;  %vm881_vm6 = vcmp.lt.s32.totalorder %v365_v24, %v2401_v7 }
 0x147   :  { %2320 = vmatprep.subr.msk.bf16.mxu1 %vm2149_vm9, %v2370_v11  ;;  %vm1118_vm10 = vmand %vm605_vm4, %vm862_vm5  ;;  %vm624_vm5 = vcmp.ge.s32.totalorder %v365_v24, %v2396_v5  ;;  %vm655_vm9 = vcmp.ge.s32.totalorder %v396_v25, %v2396_v5  ;;  %p2354_p4 = pnand %p2353_p3, %p2347_p0 }
 0x148   :  { %vm1119_vm13 = vmand %vm606_vm7, %vm863_vm8 }
 0x149   :  { %vm2101_vm0 = vmpackc.low %vm1119_vm13, %vm1118_vm10  ;;  %vm912_vm10 = vcmp.lt.s32.totalorder %v396_v25, %v2401_v7  ;;  %vm913_vm13 = vcmp.lt.s32.totalorder %v397_v26, %v2401_v7 }
 0x14a   :  { %2299 = vmatpush3.bf16.msk.msra.mxu0 %vm2101_vm0, %v2370_v11  ;;  %vm1150_vm1 = vmand %vm637_vm11, %vm894_vm12  ;;  %vm656_vm12 = vcmp.ge.s32.totalorder %v397_v26, %v2396_v5  ;;  %vm607_vm0 = vcmp.ge.s32.totalorder %v348_v27, %v2396_v5 }
 0x14b   :  { %vm1151_vm4 = vmand %vm638_vm14, %vm895_vm15 }
 0x14c   :  { %vm2133_vm7 = vmpackc.low %vm1151_vm4, %vm1150_vm1  ;;  %vm864_vm1 = vcmp.lt.s32.totalorder %v348_v27, %v2401_v7  ;;  %vm865_vm4 = vcmp.lt.s32.totalorder %v349_v15, %v2401_v7 }
 0x14d   :  { %2321 = vmatpush3.bf16.msk.msra.mxu1 %vm2133_vm7, %v2370_v11  ;;  %vm1136_vm8 = vmand %vm623_vm2, %vm880_vm3  ;;  %vm608_vm3 = vcmp.ge.s32.totalorder %v349_v15, %v2396_v5  ;;  %vm639_vm7 = vcmp.ge.s32.totalorder %v380_v28, %v2396_v5 }
 0x14e   :  { %vm1137_vm11 = vmand %vm624_vm5, %vm881_vm6 }
 0x14f   :  { %vm2119_vm14 = vmpackc.low %vm1137_vm11, %vm1136_vm8  ;;  %vm896_vm8 = vcmp.lt.s32.totalorder %v380_v28, %v2401_v7  ;;  %vm897_vm11 = vcmp.lt.s32.totalorder %v381_v29, %v2401_v7 }
 0x150   :  { %2300 = vmatprep.subr.msk.bf16.mxu0 %vm2119_vm14, %v2370_v11  ;;  %vm1168_vm15 = vmand %vm655_vm9, %vm912_vm10  ;;  %vm640_vm10 = vcmp.ge.s32.totalorder %v381_v29, %v2396_v5  ;;  %vm625_vm14 = vcmp.ge.s32.totalorder %v366_v34, %v2396_v5 }
 0x151   :  { %vm1169_vm2 = vmand %vm656_vm12, %vm913_vm13 }
 0x152   :  { %vm2151_vm5 = vmpackc.low %vm1169_vm2, %vm1168_vm15  ;;  %vm882_vm15 = vcmp.lt.s32.totalorder %v366_v34, %v2401_v7  ;;  %vm883_vm2 = vcmp.lt.s32.totalorder %v367_v30, %v2401_v7 }
 0x153   :  { %2322 = vmatprep.subr.msk.bf16.mxu1 %vm2151_vm5, %v2370_v11  ;;  %vm1120_vm6 = vmand %vm607_vm0, %vm864_vm1  ;;  %vm626_vm1 = vcmp.ge.s32.totalorder %v367_v30, %v2396_v5  ;;  %vm657_vm5 = vcmp.ge.s32.totalorder %v398_v31, %v2396_v5 }
 0x154   :  { %vm1121_vm9 = vmand %vm608_vm3, %vm865_vm4 }
 0x155   :  { %vm2103_vm12 = vmpackc.low %vm1121_vm9, %vm1120_vm6  ;;  %vm914_vm6 = vcmp.lt.s32.totalorder %v398_v31, %v2401_v7  ;;  %vm915_vm9 = vcmp.lt.s32.totalorder %v399_v32, %v2401_v7 }
 0x156   :  { %2301 = vmatpush3.bf16.msk.msra.mxu0 %vm2103_vm12, %v2370_v11  ;;  %vm1152_vm13 = vmand %vm639_vm7, %vm896_vm8  ;;  %vm658_vm8 = vcmp.ge.s32.totalorder %v399_v32, %v2396_v5  ;;  %vm609_vm12 = vcmp.ge.s32.totalorder %v350_v33, %v2396_v5 }
 0x157   :  { %vm1153_vm0 = vmand %vm640_vm10, %vm897_vm11 }
 0x158   :  { %vm2135_vm3 = vmpackc.low %vm1153_vm0, %vm1152_vm13  ;;  %vm866_vm13 = vcmp.lt.s32.totalorder %v350_v33, %v2401_v7  ;;  %vm867_vm0 = vcmp.lt.s32.totalorder %v351_v18, %v2401_v7 }
 0x159   :  { %2323 = vmatpush3.bf16.msk.msra.mxu1 %vm2135_vm3, %v2370_v11  ;;  %vm1138_vm4 = vmand %vm625_vm14, %vm882_vm15  ;;  %vm610_vm15 = vcmp.ge.s32.totalorder %v351_v18, %v2396_v5  ;;  %vm641_vm3 = vcmp.ge.s32.totalorder %v382_v36, %v2396_v5 }
 0x15a   :  { %vm1139_vm7 = vmand %vm626_vm1, %vm883_vm2 }
 0x15b   :  { %vm2121_vm10 = vmpackc.low %vm1139_vm7, %vm1138_vm4  ;;  %vm898_vm4 = vcmp.lt.s32.totalorder %v382_v36, %v2401_v7  ;;  %vm899_vm7 = vcmp.lt.s32.totalorder %v383_v35, %v2401_v7 }
 0x15c   :  { %2302 = vmatprep.subr.msk.bf16.mxu0 %vm2121_vm10, %v2370_v11  ;;  %vm1170_vm11 = vmand %vm657_vm5, %vm914_vm6  ;;  %vm642_vm6 = vcmp.ge.s32.totalorder %v383_v35, %v2396_v5  ;;  %vm627_vm10 = vcmp.ge.s32.totalorder %v368_v52, %v2396_v5 }
 0x15d   :  { %vm1171_vm14 = vmand %vm658_vm8, %vm915_vm9 }
 0x15e   :  { %vm2153_vm1 = vmpackc.low %vm1171_vm14, %vm1170_vm11  ;;  %vm884_vm11 = vcmp.lt.s32.totalorder %v368_v52, %v2401_v7  ;;  %vm885_vm14 = vcmp.lt.s32.totalorder %v369_v37, %v2401_v7 }
 0x15f   :  { %2324 = vmatprep.subr.msk.bf16.mxu1 %vm2153_vm1, %v2370_v11  ;;  %vm1122_vm2 = vmand %vm609_vm12, %vm866_vm13  ;;  %vm628_vm13 = vcmp.ge.s32.totalorder %v369_v37, %v2396_v5  ;;  %vm659_vm1 = vcmp.ge.s32.totalorder %v400_v39, %v2396_v5 }
 0x160   :  { %vm1123_vm5 = vmand %vm610_vm15, %vm867_vm0 }
 0x161   :  { %vm2105_vm8 = vmpackc.low %vm1123_vm5, %vm1122_vm2  ;;  %vm916_vm2 = vcmp.lt.s32.totalorder %v400_v39, %v2401_v7  ;;  %vm917_vm5 = vcmp.lt.s32.totalorder %v401_v41, %v2401_v7 }
 0x162   :  { %2303 = vmatpush3.bf16.msk.msra.mxu0 %vm2105_vm8, %v2370_v11  ;;  %vm1154_vm9 = vmand %vm641_vm3, %vm898_vm4  ;;  %vm660_vm4 = vcmp.ge.s32.totalorder %v401_v41, %v2396_v5  ;;  %vm611_vm8 = vcmp.ge.s32.totalorder %v352_v43, %v2396_v5 }
 0x163   :  { %vm1155_vm12 = vmand %vm642_vm6, %vm899_vm7 }
 0x164   :  { %vm2137_vm15 = vmpackc.low %vm1155_vm12, %vm1154_vm9  ;;  %vm868_vm9 = vcmp.lt.s32.totalorder %v352_v43, %v2401_v7  ;;  %vm869_vm12 = vcmp.lt.s32.totalorder %v353_v44, %v2401_v7 }
 0x165   :  { %2325 = vmatpush3.bf16.msk.msra.mxu1 %vm2137_vm15, %v2370_v11  ;;  %vm1140_vm0 = vmand %vm627_vm10, %vm884_vm11  ;;  %vm612_vm11 = vcmp.ge.s32.totalorder %v353_v44, %v2396_v5  ;;  %vm643_vm15 = vcmp.ge.s32.totalorder %v384_v45, %v2396_v5 }
 0x166   :  { %vm1141_vm3 = vmand %vm628_vm13, %vm885_vm14 }
 0x167   :  { %vm2123_vm6 = vmpackc.low %vm1141_vm3, %vm1140_vm0  ;;  %vm900_vm0 = vcmp.lt.s32.totalorder %v384_v45, %v2401_v7  ;;  %vm901_vm3 = vcmp.lt.s32.totalorder %v385_v46, %v2401_v7 }
 0x168   :  { %2304 = vmatprep.subr.msk.bf16.mxu0 %vm2123_vm6, %v2370_v11  ;;  %vm1172_vm7 = vmand %vm659_vm1, %vm916_vm2  ;;  %vm644_vm2 = vcmp.ge.s32.totalorder %v385_v46, %v2396_v5  ;;  %vm629_vm6 = vcmp.ge.s32.totalorder %v370_v47, %v2396_v5 }
 0x169   :  { %vm1173_vm10 = vmand %vm660_vm4, %vm917_vm5 }
 0x16a   :  { %vm2155_vm13 = vmpackc.low %vm1173_vm10, %vm1172_vm7  ;;  %vm886_vm7 = vcmp.lt.s32.totalorder %v370_v47, %v2401_v7  ;;  %vm887_vm10 = vcmp.lt.s32.totalorder %v371_v48, %v2401_v7 }
 0x16b   :  { %2326 = vmatprep.subr.msk.bf16.mxu1 %vm2155_vm13, %v2370_v11  ;;  %vm1124_vm14 = vmand %vm611_vm8, %vm868_vm9  ;;  %vm630_vm9 = vcmp.ge.s32.totalorder %v371_v48, %v2396_v5  ;;  %vm661_vm13 = vcmp.ge.s32.totalorder %v402_v49, %v2396_v5 }
 0x16c   :  { %vm1125_vm1 = vmand %vm612_vm11, %vm869_vm12 }
 0x16d   :  { %vm2107_vm4 = vmpackc.low %vm1125_vm1, %vm1124_vm14  ;;  %vm918_vm14 = vcmp.lt.s32.totalorder %v402_v49, %v2401_v7  ;;  %vm919_vm1 = vcmp.lt.s32.totalorder %v403_v51, %v2401_v7 }
 0x16e   :  { %2305 = vmatpush3.bf16.msk.msra.mxu0 %vm2107_vm4, %v2370_v11  ;;  %vm1156_vm5 = vmand %vm643_vm15, %vm900_vm0  ;;  %vm662_vm0 = vcmp.ge.s32.totalorder %v403_v51, %v2396_v5  ;;  %vm613_vm4 = vcmp.ge.s32.totalorder %v354_v53, %v2396_v5 }
 0x16f   :  { %vm1157_vm8 = vmand %vm644_vm2, %vm901_vm3 }
 0x170   :  { %vm2139_vm11 = vmpackc.low %vm1157_vm8, %vm1156_vm5  ;;  %vm870_vm5 = vcmp.lt.s32.totalorder %v354_v53, %v2401_v7  ;;  %vm871_vm8 = vcmp.lt.s32.totalorder %v355_v55, %v2401_v7 }
 0x171   :  { %2327 = vmatpush3.bf16.msk.msra.mxu1 %vm2139_vm11, %v2370_v11  ;;  %vm1142_vm12 = vmand %vm629_vm6, %vm886_vm7  ;;  %vm614_vm7 = vcmp.ge.s32.totalorder %v355_v55, %v2396_v5  ;;  %vm645_vm11 = vcmp.ge.s32.totalorder %v386_v56, %v2396_v5 }
 0x172   :  { %vm1143_vm15 = vmand %vm630_vm9, %vm887_vm10 }
 0x173   :  { %vm2125_vm2 = vmpackc.low %vm1143_vm15, %vm1142_vm12  ;;  %vm902_vm12 = vcmp.lt.s32.totalorder %v386_v56, %v2401_v7  ;;  %vm903_vm15 = vcmp.lt.s32.totalorder %v387_v57, %v2401_v7 }
 0x174   :  { %2306 = vmatprep.subr.msk.bf16.mxu0 %vm2125_vm2, %v2370_v11  ;;  %vm1174_vm3 = vmand %vm661_vm13, %vm918_vm14  ;;  %vm646_vm14 = vcmp.ge.s32.totalorder %v387_v57, %v2396_v5  ;;  %vm631_vm2 = vcmp.ge.s32.totalorder %v372_v58, %v2396_v5 }
 0x175   :  { %vm1175_vm6 = vmand %vm662_vm0, %vm919_vm1 }
 0x176   :  { %vm2157_vm9 = vmpackc.low %vm1175_vm6, %vm1174_vm3  ;;  %vm888_vm3 = vcmp.lt.s32.totalorder %v372_v58, %v2401_v7  ;;  %vm889_vm6 = vcmp.lt.s32.totalorder %v373_v59, %v2401_v7 }
 0x177   :  { %2328 = vmatprep.subr.msk.bf16.mxu1 %vm2157_vm9, %v2370_v11  ;;  %vm1126_vm10 = vmand %vm613_vm4, %vm870_vm5  ;;  %vm632_vm5 = vcmp.ge.s32.totalorder %v373_v59, %v2396_v5  ;;  %vm663_vm9 = vcmp.ge.s32.totalorder %v404_v38, %v2396_v5 }
 0x178   :  { %vm1127_vm13 = vmand %vm614_vm7, %vm871_vm8 }
 0x179   :  { %vm2109_vm0 = vmpackc.low %vm1127_vm13, %vm1126_vm10  ;;  %vm920_vm10 = vcmp.lt.s32.totalorder %v404_v38, %v2401_v7  ;;  %vm921_vm13 = vcmp.lt.s32.totalorder %v405_v60, %v2401_v7 }
 0x17a   :  { %2307 = vmatpush3.bf16.msk.msra.mxu0 %vm2109_vm0, %v2370_v11  ;;  %vm1158_vm1 = vmand %vm645_vm11, %vm902_vm12  ;;  %vm664_vm12 = vcmp.ge.s32.totalorder %v405_v60, %v2396_v5  ;;  %vm615_vm0 = vcmp.ge.s32.totalorder %v356_v61, %v2396_v5 }
 0x17b   :  { %vm1159_vm4 = vmand %vm646_vm14, %vm903_vm15 }
 0x17c   :  { %vm2141_vm7 = vmpackc.low %vm1159_vm4, %vm1158_vm1  ;;  %vm872_vm1 = vcmp.lt.s32.totalorder %v356_v61, %v2401_v7  ;;  %vm873_vm4 = vcmp.lt.s32.totalorder %v357_v40, %v2401_v7 }
 0x17d   :  { %2329 = vmatpush3.bf16.msk.msra.mxu1 %vm2141_vm7, %v2370_v11  ;;  %vm1144_vm8 = vmand %vm631_vm2, %vm888_vm3  ;;  %vm616_vm3 = vcmp.ge.s32.totalorder %v357_v40, %v2396_v5  ;;  %vm647_vm7 = vcmp.ge.s32.totalorder %v388_v2, %v2396_v5 }
 0x17e   :  { %vm1145_vm11 = vmand %vm632_vm5, %vm889_vm6 }
 0x17f   :  { %vm2127_vm14 = vmpackc.low %vm1145_vm11, %vm1144_vm8  ;;  %vm904_vm8 = vcmp.lt.s32.totalorder %v388_v2, %v2401_v7  ;;  %vm905_vm11 = vcmp.lt.s32.totalorder %v389_v50, %v2401_v7 }
 0x180   :  { %2308 = vmatprep.subr.msk.bf16.mxu0 %vm2127_vm14, %v2370_v11  ;;  %vm1176_vm15 = vmand %vm663_vm9, %vm920_vm10  ;;  %vm648_vm10 = vcmp.ge.s32.totalorder %v389_v50, %v2396_v5 }
 0x181   :  { %vm1177_vm2 = vmand %vm664_vm12, %vm921_vm13 }
 0x182   :  { %vm2159_vm5 = vmpackc.low %vm1177_vm2, %vm1176_vm15 }
 0x183   :  { %2330 = vmatprep.subr.msk.bf16.mxu1 %vm2159_vm5, %v2370_v11  ;;  %vm1128_vm6 = vmand %vm615_vm0, %vm872_vm1 }
 0x184   :  { %vm1129_vm9 = vmand %vm616_vm3, %vm873_vm4 }
 0x185   :  { %vm2111_vm12 = vmpackc.low %vm1129_vm9, %vm1128_vm6 }
 0x186   :  { %2309 = vmatpush3.bf16.msk.msra.mxu0 %vm2111_vm12, %v2370_v11  ;;  %vm1160_vm13 = vmand %vm647_vm7, %vm904_vm8 }
 0x187   :  { %vm1161_vm14 = vmand %vm648_vm10, %vm905_vm11 }
 0x188   :  { %vm2143_vm15 = vmpackc.low %vm1161_vm14, %vm1160_vm13 }
 0x189   :  { %2331 = vmatpush3.bf16.msk.msra.mxu1 %vm2143_vm15, %v2370_v11  ;;  %1837 = vmatmul.mubr.bf16.vlgmr.msra.gmra.mrb[12].mxu0 %v145_v54 }
 0x18c   :  { %1877 = vmatmul.mubr.bf16.vlgmr.msra.gmra.mrb[12].mxu1 %v147_v42 }
 0x19c   :  { %v2222_v8 = vpop.f32.mrb[4].mxu0 }
 0x19d   :  { %v2223_v9 = vpop.f32.mrb[5].mxu0 }
 0x19e   :  { %v2224_v10 = vadd.f32 %v2223_v9, %v2222_v8  ;;  %v2225_v12 = vpop.f32.mrb[6].mxu0 }
 0x19f   :  { %v2244_v5 = vpop.f32.mrb[4].mxu1  ;;  %v2226_v13 = vpop.f32.mrb[7].mxu0 }
 0x1a0   :  { %v1679_v7 = vadd.f32 %v2224_v10, %v3294_v21  ;;  %v2245_v14 = vpop.f32.mrb[5].mxu1 }
 0x1a1   :  { %v2246_v16 = vadd.f32 %v2245_v14, %v2244_v5  ;;  %v2247_v17 = vpop.f32.mrb[6].mxu1 }
 0x1a2   :  { %v2248_v19 = vpop.f32.mrb[7].mxu1 }
 0x1a3   :  { %v1719_v20 = vadd.f32 %v2246_v16, %v1679_v7 }
 0x1fc   :  { %v2266_v22 = vpop.f32.mrb[8].mxu0 }
 0x1fd   :  { %v2267_v23 = vpop.f32.mrb[9].mxu0 }
 0x1fe   :  { %v2268_v24 = vadd.f32 %v2267_v23, %v2266_v22  ;;  %v2269_v25 = vpop.f32.mrb[10].mxu0 }
 0x1ff   :  { %v2288_v11 = vpop.f32.mrb[8].mxu1  ;;  %v2270_v26 = vpop.f32.mrb[11].mxu0 }
 0x200   :  { %v1759_v27 = vadd.f32 %v2268_v24, %v1719_v20  ;;  %v2289_v15 = vpop.f32.mrb[9].mxu1 }
 0x201   :  { %v2290_v28 = vadd.f32 %v2289_v15, %v2288_v11  ;;  %v2291_v29 = vpop.f32.mrb[10].mxu1 }
 0x202   :  { %v2292_v34 = vpop.f32.mrb[11].mxu1 }
 0x203   :  { %v1799_v30 = vadd.f32 %v2290_v28, %v1759_v27 }
 0x25c   :  { %v2310_v31 = vpop.f32.mrb[12].mxu0 }
 0x25d   :  { %v2311_v32 = vpop.f32.mrb[13].mxu0 }
 0x25e   :  { %v2312_v21 = vadd.f32 %v2311_v32, %v2310_v31  ;;  %v2313_v33 = vpop.f32.mrb[14].mxu0 }
 0x25f   :  { %v2332_v18 = vpop.f32.mrb[12].mxu1  ;;  %v2314_v36 = vpop.f32.mrb[15].mxu0 }
 0x260   :  { %v1839_v35 = vadd.f32 %v2312_v21, %v1799_v30  ;;  %v2333_v52 = vpop.f32.mrb[13].mxu1 }
 0x261   :  { %v2334_v37 = vadd.f32 %v2333_v52, %v2332_v18  ;;  %v2335_v39 = vpop.f32.mrb[14].mxu1 }
 0x262   :  { %v2336_v41 = vpop.f32.mrb[15].mxu1 }
 0x263   :  { %v1879_v43 = vadd.f32 %v2334_v37, %v1839_v35 }
 0x265   :  { %v2161_v44 = vmul.f32 -1.442695, %v1879_v43 }
 0x267   :  { %2340 = vpow2.f32 %v2161_v44 }
 0x271   :  { %v2341_v45 = vpop.eup %2340 }
 0x272   :  { %v1887_v46 = vadd.f32 1.0, %v2341_v45 }
 0x274   :  { %2342 = vrcp.f32 %v1887_v46 }
 0x27e   :  { %v2343_v47 = vpop.eup %2342 }
 0x27f   :  { %1890 = vst [vmem:[#allocation3] sm:$0xff] %v2343_v47 }
 0x280   :  { %2357 = shalt.err (!%p2354_p4)
}
 0x281   :  { %s2358_s29 = scalar_lea.hbm %s3478_s3, 128 }
 0x282   :  { %p2359_p5 = scmp.ne.s32.totalorder %s3478_s3, %s2358_s29  ;;  %p2362_p6 = scmp.lt.u32.totalorder %s2358_s29, %s3478_s3 }
 0x284   :  { %p2364_p7 = pnand %p2362_p6, %p2359_p5 }
 0x286   :  { %2367 = shalt.err (!%p2364_p7)
}
 0x287   :  { %1900 = dma.vmem_to_hbm [thread:$0]  %s1898_s25, 128, %s3478_s3, [#allocation4]  }
 0x288   :  { %2368 = dma.done.wait [#allocation4], 128  }
 0x289   :  { %2369 = vsyncadd [#allocation4], 4294967168 }
 0x28a   :  { %1904 = vsyncpa [#allocation4], 1 }

</bundles_post_ra>
